<compile_context>
chip_gen: v7x
topology: tpu7x:2x2x1
jax: 0.10.0
libtpu: 0.0.40
codegen_flags: <defaults>
</compile_context>

<pallas_src>
import numpy as np
import jax
import jax.numpy as jnp
from jax.experimental import pallas as pl
from jax.experimental.pallas import tpu as pltpu

# ---------------- problem sizes ----------------
N, C, H, W = 2, 3, 64, 64        # input NCHW
P = 32                           # encoder downsample factor (kernel=stride=32)
Hp, Wp = H // P, W // P          # encoder feature spatial size (2, 2)
E = 32                           # encoder feature channels
K = 8                            # decoder num_classes
SCALE = 32                       # F.interpolate scale_factor
HOUT, WOUT = Hp * SCALE, Wp * SCALE
S = Hp * Wp                      # patch positions per image (4)
CPP = C * P * P                  # patch feature length (3072)
OUT = HOUT * WOUT                # flattened output spatial (4096)
M = N * S                        # total patch rows


# ---------------- fused Pallas kernel ----------------
def fcn_fused_kernel(p_ref, wet_ref, be_ref, wd_ref, bd_ref, kron_ref, o_ref):
    # p_ref:    (1, S, CPP)   patch rows for one batch element
    # wet_ref:  (CPP, E)      encoder conv weight (flattened, transposed)
    # be_ref:   (1, E)        encoder bias
    # wd_ref:   (K, E)        decoder 1x1 conv weight
    # bd_ref:   (K, 1)        decoder bias (column)
    # kron_ref: (S, OUT)      kron(A_y, A_x)^T bilinear upsample matrix
    # o_ref:    (1, K, OUT)   output slab for this batch element (lane-dense)

    # Encoder: /32 patch conv + ReLU. Only MXU op in the kernel (contraction = 3072).
    h = jnp.dot(p_ref[0], wet_ref[...], preferred_element_type=jnp.float32) + be_ref[...]
    h = jnp.maximum(h, 0.0)                                # (S, E)

    wd = wd_ref[...]                                       # (K, E)
    bd = bd_ref[...]                                       # (K, 1)
    kron = kron_ref[...]                                   # (S, OUT)

    out = None
    for s in range(S):  # static unroll (S = 4)
        # Decoder 1x1 conv as a weighted sum over E -> one class column per
        # patch position (avoids a degenerate 8x32@32x8 MXU matmul).
        f_s = jnp.sum(wd * h[s:s + 1, :], axis=1, keepdims=True) + bd   # (K, 1)
        # Bilinear x32 upsample contribution of patch position s:
        # broadcast FMA onto the lane-dense (K, OUT) output slab (pure VPU,
        # ~32 vregs * 2 ops * S = 256 vreg-ops per batch element).
        term = f_s * kron[s:s + 1, :]                                   # (K, OUT)
        out = term if out is None else out + term
    o_ref[0] = out.astype(o_ref.dtype)


def _cost_estimate():
    flops = 2 * M * CPP * E + 2 * M * E * K + 2 * N * K * S * OUT
    bytes_accessed = 4 * (N * S * CPP + CPP * E + E + K * E + K + S * OUT + N * K * OUT)
    return pl.CostEstimate(flops=flops, transcendentals=0, bytes_accessed=bytes_accessed)


def run_fcn_fused(patches3, we_t, be2, wd2, bd2, kron_t):
    return pl.pallas_call(
        fcn_fused_kernel,
        out_shape=jax.ShapeDtypeStruct((N, K, OUT), jnp.float32),
        grid=(N,),
        in_specs=[
            pl.BlockSpec((1, S, CPP), lambda n: (n, 0, 0)),
            pl.BlockSpec((CPP, E), lambda n: (0, 0)),      # constant index -> stays resident
            pl.BlockSpec((1, E), lambda n: (0, 0)),
            pl.BlockSpec((K, E), lambda n: (0, 0)),
            pl.BlockSpec((K, 1), lambda n: (0, 0)),
            pl.BlockSpec((S, OUT), lambda n: (0, 0)),
        ],
        out_specs=pl.BlockSpec((1, K, OUT), lambda n: (n, 0, 0)),
        compiler_params=pltpu.CompilerParams(dimension_semantics=("parallel",)),
        cost_estimate=_cost_estimate(),
    )(patches3, we_t, be2, wd2, bd2, kron_t)


# ---------------- glue: patch extraction, interpolation matrices ----------------
def extract_patches(x):
    # NCHW -> (N, S, CPP); inner column order (c, ph, pw) matches conv-weight flattening.
    xp = x.reshape(N, C, Hp, P, Wp, P).transpose(0, 2, 4, 1, 3, 5)
    return xp.reshape(N, S, CPP)


def bilinear_matrix(L, s):
    # PyTorch F.interpolate(..., mode='bilinear', align_corners=False) weights (1-D).
    Lout = L * s
    o = np.arange(Lout, dtype=np.float64)
    src = np.maximum((o + 0.5) / s - 0.5, 0.0)
    i0 = np.minimum(np.floor(src).astype(np.int64), L - 1)
    i1 = np.minimum(i0 + 1, L - 1)
    lam = src - i0
    A = np.zeros((Lout, L), dtype=np.float32)
    A[np.arange(Lout), i0] += (1.0 - lam).astype(np.float32)
    A[np.arange(Lout), i1] += lam.astype(np.float32)
    return A


def prepare_params(we, be, wd, bd):
    # One-time layout prep (kept OUT of the per-call forward path):
    #   * encoder weight flattened + transposed to (CPP, E) for a lane-friendly matmul
    #   * decoder weight/bias reshaped to 2-D
    #   * x32 bilinear upsample matrix kron(A_y, A_x)^T as a (S, OUT) lane-dense slab
    we_t = jnp.asarray(np.asarray(we).reshape(E, CPP).T)   # (CPP, E)
    be2 = jnp.asarray(np.asarray(be).reshape(1, E))        # (1, E)
    wd2 = jnp.asarray(np.asarray(wd).reshape(K, E))        # (K, E)
    bd2 = jnp.asarray(np.asarray(bd).reshape(K, 1))        # (K, 1)
    a_y = bilinear_matrix(Hp, SCALE)                       # (HOUT, Hp)
    a_x = bilinear_matrix(Wp, SCALE)                       # (WOUT, Wp)
    kron_t = jnp.asarray(np.kron(a_y, a_x).T)              # (S, OUT) = (4, 4096)
    return we_t, be2, wd2, bd2, kron_t


@jax.jit
def fcn_forward(x, we_t, be2, wd2, bd2, kron_t):
    patches3 = extract_patches(x)                          # (N, S, CPP), ~98 KB
    out = run_fcn_fused(patches3, we_t, be2, wd2, bd2, kron_t)   # (N, K, OUT)
    return out.reshape(N, K, HOUT, WOUT)                   # pure reshape, zero-copy


def fcn_reference(x, we, be, wd, bd, a_y, a_x):
    patches = extract_patches(x).reshape(M, CPP)
    h = jnp.maximum(patches @ we.reshape(E, CPP).T + be, 0.0)
    y = h @ wd.reshape(K, E).T + bd
    feat = y.reshape(N, Hp, Wp, K).transpose(0, 3, 1, 2)
    return jnp.einsum("yh,nkhw,xw->nkyx", a_y, feat, a_x)


if __name__ == "__main__":
    key = jax.random.PRNGKey(0)
    kx, kwe, kbe, kwd, kbd = jax.random.split(key, 5)

    x = jax.random.normal(kx, (N, C, H, W), dtype=jnp.float32)
    we = jax.random.normal(kwe, (E, C, P, P), dtype=jnp.float32) / np.sqrt(CPP)
    be = jax.random.normal(kbe, (E,), dtype=jnp.float32) * 0.1
    wd = jax.random.normal(kwd, (K, E, 1, 1), dtype=jnp.float32) / np.sqrt(E)
    bd = jax.random.normal(kbd, (K,), dtype=jnp.float32) * 0.1

    # one-time parameter layout prep (not part of the timed forward)
    we_t, be2, wd2, bd2, kron_t = prepare_params(we, be, wd, bd)
    a_y = jnp.asarray(bilinear_matrix(Hp, SCALE))
    a_x = jnp.asarray(bilinear_matrix(Wp, SCALE))

    out = jax.block_until_ready(fcn_forward(x, we_t, be2, wd2, bd2, kron_t))
    ref = jax.block_until_ready(fcn_reference(x, we, be, wd, bd, a_y, a_x))

    assert out.shape == (N, K, HOUT, WOUT), out.shape
    assert bool(jnp.all(jnp.isfinite(out)))
    np.testing.assert_allclose(np.asarray(out), np.asarray(ref), rtol=2e-3, atol=2e-3)

    print("KERNEL_OK")
</pallas_src>

<mosaic_0001>
module attributes {stable_mosaic.version = 11 : i64} {
  func.func @fcn_fused_kernel(%arg0: i32, %arg1: memref<1x4x3072xf32, #tpu.memory_space<vmem>>, %arg2: memref<3072x32xf32, #tpu.memory_space<vmem>>, %arg3: memref<1x32xf32, #tpu.memory_space<vmem>>, %arg4: memref<8x32xf32, #tpu.memory_space<vmem>>, %arg5: memref<8x1xf32, #tpu.memory_space<vmem>>, %arg6: memref<4x4096xf32, #tpu.memory_space<vmem>>, %arg7: memref<1x8x4096xf32, #tpu.memory_space<vmem>>) attributes {dimension_semantics = [#tpu.dimension_semantics<parallel>], iteration_bounds = array<i64: 2>, scalar_prefetch = 0 : i64, scratch_operands = 0 : i64, tpu.core_type = #tpu.core_type<tc>, window_params = [{transform_indices = @transform_0, window_bounds = array<i64: 1, 4, 3072>}, {pipeline_mode = #tpu.pipeline_mode<synchronous>, transform_indices = @transform_1, window_bounds = array<i64: 3072, 32>}, {pipeline_mode = #tpu.pipeline_mode<synchronous>, transform_indices = @transform_2, window_bounds = array<i64: 1, 32>}, {pipeline_mode = #tpu.pipeline_mode<synchronous>, transform_indices = @transform_3, window_bounds = array<i64: 8, 32>}, {pipeline_mode = #tpu.pipeline_mode<synchronous>, transform_indices = @transform_4, window_bounds = array<i64: 8, 1>}, {pipeline_mode = #tpu.pipeline_mode<synchronous>, transform_indices = @transform_5, window_bounds = array<i64: 4, 4096>}, {transform_indices = @transform_6, window_bounds = array<i64: 1, 8, 4096>}]} {
    %c0 = arith.constant 0 : index
    %c0_0 = arith.constant 0 : index
    %c0_1 = arith.constant 0 : index
    %0 = vector.load %arg1[%c0, %c0_0, %c0_1] : memref<1x4x3072xf32, #tpu.memory_space<vmem>>, vector<1x4x3072xf32>
    %1 = vector.shape_cast %0 : vector<1x4x3072xf32> to vector<4x3072xf32>
    %c0_2 = arith.constant 0 : index
    %c0_3 = arith.constant 0 : index
    %2 = vector.load %arg2[%c0_2, %c0_3] : memref<3072x32xf32, #tpu.memory_space<vmem>>, vector<3072x32xf32>
    %cst = arith.constant dense<0.000000e+00> : vector<4x32xf32>
    %3 = tpu.matmul %1, %2, %cst {dimension_numbers = #tpu.dot_dimension_numbers<[1], [0], [0], [1], [0, 0, 1, 1], [], []>} : vector<4x3072xf32>, vector<3072x32xf32>, vector<4x32xf32> -> vector<4x32xf32>
    %c0_4 = arith.constant 0 : index
    %c0_5 = arith.constant 0 : index
    %4 = vector.load %arg3[%c0_4, %c0_5] : memref<1x32xf32, #tpu.memory_space<vmem>>, vector<1x32xf32>
    %5 = vector.broadcast %4 : vector<1x32xf32> to vector<4x32xf32>
    %6 = arith.addf %3, %5 : vector<4x32xf32>
    %cst_6 = arith.constant 0.000000e+00 : f32
    %7 = vector.broadcast %cst_6 : f32 to vector<4x32xf32>
    %8 = arith.maximumf %6, %7 : vector<4x32xf32>
    %c0_7 = arith.constant 0 : index
    %c0_8 = arith.constant 0 : index
    %9 = vector.load %arg4[%c0_7, %c0_8] : memref<8x32xf32, #tpu.memory_space<vmem>>, vector<8x32xf32>
    %c0_9 = arith.constant 0 : index
    %c0_10 = arith.constant 0 : index
    %10 = vector.load %arg5[%c0_9, %c0_10] : memref<8x1xf32, #tpu.memory_space<vmem>>, vector<8x1xf32>
    %c0_11 = arith.constant 0 : index
    %c0_12 = arith.constant 0 : index
    %11 = vector.load %arg6[%c0_11, %c0_12] : memref<4x4096xf32, #tpu.memory_space<vmem>>, vector<4x4096xf32>
    %12 = vector.extract_strided_slice %8 {offsets = [0, 0], sizes = [1, 32], strides = [1, 1]} : vector<4x32xf32> to vector<1x32xf32>
    %13 = vector.broadcast %12 : vector<1x32xf32> to vector<8x32xf32>
    %14 = arith.mulf %9, %13 : vector<8x32xf32>
    %cst_13 = arith.constant dense<0.000000e+00> : vector<8xf32>
    %15 = vector.multi_reduction <add>, %14, %cst_13 [1] : vector<8x32xf32> to vector<8xf32>
    %16 = vector.shape_cast %15 : vector<8xf32> to vector<8x1xf32>
    %17 = arith.addf %16, %10 : vector<8x1xf32>
    %18 = vector.extract_strided_slice %11 {offsets = [0, 0], sizes = [1, 4096], strides = [1, 1]} : vector<4x4096xf32> to vector<1x4096xf32>
    %19 = vector.broadcast %17 : vector<8x1xf32> to vector<8x4096xf32>
    %20 = vector.broadcast %18 : vector<1x4096xf32> to vector<8x4096xf32>
    %21 = arith.mulf %19, %20 : vector<8x4096xf32>
    %22 = vector.extract_strided_slice %8 {offsets = [1, 0], sizes = [1, 32], strides = [1, 1]} : vector<4x32xf32> to vector<1x32xf32>
    %23 = vector.broadcast %22 : vector<1x32xf32> to vector<8x32xf32>
    %24 = arith.mulf %9, %23 : vector<8x32xf32>
    %cst_14 = arith.constant dense<0.000000e+00> : vector<8xf32>
    %25 = vector.multi_reduction <add>, %24, %cst_14 [1] : vector<8x32xf32> to vector<8xf32>
    %26 = vector.shape_cast %25 : vector<8xf32> to vector<8x1xf32>
    %27 = arith.addf %26, %10 : vector<8x1xf32>
    %28 = vector.extract_strided_slice %11 {offsets = [1, 0], sizes = [1, 4096], strides = [1, 1]} : vector<4x4096xf32> to vector<1x4096xf32>
    %29 = vector.broadcast %27 : vector<8x1xf32> to vector<8x4096xf32>
    %30 = vector.broadcast %28 : vector<1x4096xf32> to vector<8x4096xf32>
    %31 = arith.mulf %29, %30 : vector<8x4096xf32>
    %32 = arith.addf %21, %31 : vector<8x4096xf32>
    %33 = vector.extract_strided_slice %8 {offsets = [2, 0], sizes = [1, 32], strides = [1, 1]} : vector<4x32xf32> to vector<1x32xf32>
    %34 = vector.broadcast %33 : vector<1x32xf32> to vector<8x32xf32>
    %35 = arith.mulf %9, %34 : vector<8x32xf32>
    %cst_15 = arith.constant dense<0.000000e+00> : vector<8xf32>
    %36 = vector.multi_reduction <add>, %35, %cst_15 [1] : vector<8x32xf32> to vector<8xf32>
    %37 = vector.shape_cast %36 : vector<8xf32> to vector<8x1xf32>
    %38 = arith.addf %37, %10 : vector<8x1xf32>
    %39 = vector.extract_strided_slice %11 {offsets = [2, 0], sizes = [1, 4096], strides = [1, 1]} : vector<4x4096xf32> to vector<1x4096xf32>
    %40 = vector.broadcast %38 : vector<8x1xf32> to vector<8x4096xf32>
    %41 = vector.broadcast %39 : vector<1x4096xf32> to vector<8x4096xf32>
    %42 = arith.mulf %40, %41 : vector<8x4096xf32>
    %43 = arith.addf %32, %42 : vector<8x4096xf32>
    %44 = vector.extract_strided_slice %8 {offsets = [3, 0], sizes = [1, 32], strides = [1, 1]} : vector<4x32xf32> to vector<1x32xf32>
    %45 = vector.broadcast %44 : vector<1x32xf32> to vector<8x32xf32>
    %46 = arith.mulf %9, %45 : vector<8x32xf32>
    %cst_16 = arith.constant dense<0.000000e+00> : vector<8xf32>
    %47 = vector.multi_reduction <add>, %46, %cst_16 [1] : vector<8x32xf32> to vector<8xf32>
    %48 = vector.shape_cast %47 : vector<8xf32> to vector<8x1xf32>
    %49 = arith.addf %48, %10 : vector<8x1xf32>
    %50 = vector.extract_strided_slice %11 {offsets = [3, 0], sizes = [1, 4096], strides = [1, 1]} : vector<4x4096xf32> to vector<1x4096xf32>
    %51 = vector.broadcast %49 : vector<8x1xf32> to vector<8x4096xf32>
    %52 = vector.broadcast %50 : vector<1x4096xf32> to vector<8x4096xf32>
    %53 = arith.mulf %51, %52 : vector<8x4096xf32>
    %54 = arith.addf %43, %53 : vector<8x4096xf32>
    %c0_17 = arith.constant 0 : index
    %c0_18 = arith.constant 0 : index
    %c0_19 = arith.constant 0 : index
    %55 = vector.load %arg7[%c0_17, %c0_18, %c0_19] : memref<1x8x4096xf32, #tpu.memory_space<vmem>>, vector<1x8x4096xf32>
    %56 = vector.shape_cast %55 : vector<1x8x4096xf32> to vector<8x4096xf32>
    %57 = vector.shape_cast %54 : vector<8x4096xf32> to vector<1x8x4096xf32>
    tpu.vector_store %arg7[%c0_17, %c0_18, %c0_19], %57 {strides = array<i32>} : memref<1x8x4096xf32, #tpu.memory_space<vmem>>, vector<1x8x4096xf32>,
    return
  }
  func.func @transform_0(%arg0: i32) -> (i32, i32, i32) {
    %c0_i32 = arith.constant 0 : i32
    %c0_i32_0 = arith.constant 0 : i32
    %c0_i32_1 = arith.constant 0 : i32
    return %arg0, %c0_i32, %c0_i32_0 : i32, i32, i32
  }
  func.func @transform_1(%arg0: i32) -> (i32, i32) {
    %c0_i32 = arith.constant 0 : i32
    %c0_i32_0 = arith.constant 0 : i32
    %c0_i32_1 = arith.constant 0 : i32
    return %c0_i32, %c0_i32_0 : i32, i32
  }
  func.func @transform_2(%arg0: i32) -> (i32, i32) {
    %c0_i32 = arith.constant 0 : i32
    %c0_i32_0 = arith.constant 0 : i32
    %c0_i32_1 = arith.constant 0 : i32
    return %c0_i32, %c0_i32_0 : i32, i32
  }
  func.func @transform_3(%arg0: i32) -> (i32, i32) {
    %c0_i32 = arith.constant 0 : i32
    %c0_i32_0 = arith.constant 0 : i32
    %c0_i32_1 = arith.constant 0 : i32
    return %c0_i32, %c0_i32_0 : i32, i32
  }
  func.func @transform_4(%arg0: i32) -> (i32, i32) {
    %c0_i32 = arith.constant 0 : i32
    %c0_i32_0 = arith.constant 0 : i32
    %c0_i32_1 = arith.constant 0 : i32
    return %c0_i32, %c0_i32_0 : i32, i32
  }
  func.func @transform_5(%arg0: i32) -> (i32, i32) {
    %c0_i32 = arith.constant 0 : i32
    %c0_i32_0 = arith.constant 0 : i32
    %c0_i32_1 = arith.constant 0 : i32
    return %c0_i32, %c0_i32_0 : i32, i32
  }
  func.func @transform_6(%arg0: i32) -> (i32, i32, i32) {
    %c0_i32 = arith.constant 0 : i32
    %c0_i32_0 = arith.constant 0 : i32
    %c0_i32_1 = arith.constant 0 : i32
    return %arg0, %c0_i32, %c0_i32_0 : i32, i32, i32
  }
}

</mosaic_0001>

<bundles_post_ra>
// kernel: fcn_forward.1
= control target key start
LH: loop header
LB: loop body
LE: loop exit
PB: predicated region body
PF: predicated region fallthrough
CT: control target
= control target key end

     0   :  { %s3970_s21 = smov 0   ;;  %s6522_s0 = inlined_call_operand.vmem [shape: f32[2,4,3072], index: 0, kind: input, shape index: {}]   ;;  %s6523_s1 = inlined_call_operand.vmem [shape: f32[3072,32], index: 1, kind: input, shape index: {}]   ;;  %s6524_s2 = inlined_call_operand.vmem [shape: f32[1,32], index: 2, kind: input, shape index: {}]   ;;  %s6525_s3 = inlined_call_operand.vmem [shape: f32[8,32], index: 3, kind: input, shape index: {}]   ;;  %s6526_s4 = inlined_call_operand.vmem [shape: f32[8,1], index: 4, kind: input, shape index: {}]   ;;  %s6527_s5 = inlined_call_operand.vmem [shape: f32[4,4096], index: 5, kind: input, shape index: {}]   ;;  %s6528_s6 = inlined_call_operand.vmem [shape: f32[2,8,4096], index: 6, kind: output, shape index: {}]  }
   0x1 LB: > { %s3086_s22 = sadd.s32 4294967295, %s3932_s21   ;;  %p3090_p0 = scmp.ge.s32.totalorder %s3932_s21, 1  ;;  %s3932_s21 = sphi %s3970_s21, %s16_s21  }
   0x2   : > { %p212_p1 = scmp.lt.s32.totalorder %s3932_s21, 3 }
   0x4   : > { %p213_p2 = pnand %p3090_p0, %p212_p1 }
   0x6   : > { %216 = sbr.rel (%p213_p2) target bundleno = 781 (0x30d), region = 44 }
   0xd   : > { %v280_v0 = vld [vmem:[%s6523_s1 + $0x80] sm:$0xff]  ;;  %v281_v1 = vld [vmem:[%s6523_s1 + $0x88] sm:$0xff]  ;;  %v282_v11 = vld [vmem:[%s6523_s1 + $0x90] sm:$0xff]  ;;  %p4043_p3 = scmp.lt.s32.totalorder %s3086_s22, 1  ;;  %vm1555_vm0 = vcmask 261120  }
   0xe   : > { %v264_v2 = vld [vmem:[%s6523_s1] sm:$0xff]  ;;  %v3518_v3 = vpack.c.bf16 %v281_v1, %v280_v0  ;;  %v265_v4 = vld [vmem:[%s6523_s1 + $0x8] sm:$0xff]  ;;  %v283_v13 = vld [vmem:[%s6523_s1 + $0x98] sm:$0xff] }
   0xf   : > { %v312_v5 = vld [vmem:[%s6523_s1 + $0x180] sm:$0xff]  ;;  %v313_v6 = vld [vmem:[%s6523_s1 + $0x188] sm:$0xff]  ;;  %v3520_v7 = vpack.c.bf16 %v265_v4, %v264_v2  ;;  %v266_v14 = vld [vmem:[%s6523_s1 + $0x10] sm:$0xff]  ;;  %v3522_v16 = vpack.c.bf16 %v283_v13, %v282_v11  ;;  %s6841_s22 = smov (!%p4043_p3, %s3086_s22), 1 }
  0x10   : > { %v3550_v8 = vpack.c.bf16 %v313_v6, %v312_v5  ;;  %v296_v9 = vld [vmem:[%s6523_s1 + $0x100] sm:$0xff]  ;;  %v297_v10 = vld [vmem:[%s6523_s1 + $0x108] sm:$0xff]  ;;  %3519 = vmatprep.subr.bf16.mxu0 %v3518_v3  ;;  %v267_v15 = vld [vmem:[%s6523_s1 + $0x18] sm:$0xff]  ;;  %s3902_s18 = smul.u32 96, %s6841_s22  ;;  %s3097_s26 = sshll.u32 %s6841_s22, 8 }
  0x11   : > { %v3552_v12 = vpack.c.bf16 %v297_v10, %v296_v9  ;;  %3521 = vmatpush3.bf16.msra.mxu0 %v3520_v7  ;;  %v3524_v17 = vpack.c.bf16 %v267_v15, %v266_v14  ;;  %v314_v18 = vld [vmem:[%s6523_s1 + $0x190] sm:$0xff]  ;;  %v315_v19 = vld [vmem:[%s6523_s1 + $0x198] sm:$0xff]  ;;  %v284_v23 = vld [vmem:[%s6523_s1 + $0xa0] sm:$0xff] }
  0x12   : > { %3551 = vmatprep.subr.bf16.mxu1 %v3550_v8  ;;  %v298_v20 = vld [vmem:[%s6523_s1 + $0x110] sm:$0xff]  ;;  %v3554_v21 = vpack.c.bf16 %v315_v19, %v314_v18  ;;  %v299_v22 = vld [vmem:[%s6523_s1 + $0x118] sm:$0xff]  ;;  %v285_v24 = vld [vmem:[%s6523_s1 + $0xa8] sm:$0xff]  ;;  %3523 = vmatprep.subr.bf16.mxu0 %v3522_v16  ;;  %s4144_s15 = scalar_lea.vmem %s6522_s0, %s3902_s18  ;;  %s6449_s18 = scalar_lea.vmem %s6528_s6, %s3097_s26 }
  0x13   : > { %3553 = vmatpush3.bf16.msra.mxu1 %v3552_v12  ;;  %v3556_v25 = vpack.c.bf16 %v299_v22, %v298_v20  ;;  %v3526_v26 = vpack.c.bf16 %v285_v24, %v284_v23  ;;  %v268_v27 = vld [vmem:[%s6523_s1 + $0x20] sm:$0xff]  ;;  %v269_v28 = vld [vmem:[%s6523_s1 + $0x28] sm:$0xff]  ;;  %v286_v35 = vld [vmem:[%s6523_s1 + $0xb0] sm:$0xff] }
  0x14   : > { %v316_v29 = vld [vmem:[%s6523_s1 + $0x1a0] sm:$0xff]  ;;  %3555 = vmatprep.subr.bf16.mxu1 %v3554_v21  ;;  %v317_v30 = vld [vmem:[%s6523_s1 + $0x1a8] sm:$0xff]  ;;  %v3528_v33 = vpack.c.bf16 %v269_v28, %v268_v27  ;;  %v287_v36 = vld [vmem:[%s6523_s1 + $0xb8] sm:$0xff] }
  0x15   : > { %v300_v31 = vld [vmem:[%s6523_s1 + $0x120] sm:$0xff]  ;;  %v301_v32 = vld [vmem:[%s6523_s1 + $0x128] sm:$0xff]  ;;  %3525 = vmatpush3.bf16.msra.mxu0 %v3524_v17  ;;  %v3558_v34 = vpack.c.bf16 %v317_v30, %v316_v29  ;;  %v270_v37 = vld [vmem:[%s6523_s1 + $0x30] sm:$0xff]  ;;  %v3530_v39 = vpack.c.bf16 %v287_v36, %v286_v35 }
  0x16   : > { %3527 = vmatprep.subr.bf16.mxu0 %v3526_v26  ;;  %v3560_v38 = vpack.c.bf16 %v301_v32, %v300_v31  ;;  %v271_v40 = vld [vmem:[%s6523_s1 + $0x38] sm:$0xff]  ;;  %v318_v41 = vld [vmem:[%s6523_s1 + $0x1b0] sm:$0xff]  ;;  %v288_v46 = vld [vmem:[%s6523_s1 + $0xc0] sm:$0xff] }
  0x17   : > { %3557 = vmatpush3.bf16.msra.mxu1 %v3556_v25  ;;  %v319_v42 = vld [vmem:[%s6523_s1 + $0x1b8] sm:$0xff]  ;;  %v302_v44 = vld [vmem:[%s6523_s1 + $0x130] sm:$0xff]  ;;  %v289_v47 = vld [vmem:[%s6523_s1 + $0xc8] sm:$0xff]  ;;  %v3532_v48 = vpack.c.bf16 %v271_v40, %v270_v37 }
  0x18   : > { %3559 = vmatprep.subr.bf16.mxu1 %v3558_v34  ;;  %v3562_v43 = vpack.c.bf16 %v319_v42, %v318_v41  ;;  %v303_v45 = vld [vmem:[%s6523_s1 + $0x138] sm:$0xff]  ;;  %v320_v49 = vld [vmem:[%s6523_s1 + $0x1c0] sm:$0xff]  ;;  %v321_v50 = vld [vmem:[%s6523_s1 + $0x1c8] sm:$0xff]  ;;  %v3534_v52 = vpack.c.bf16 %v289_v47, %v288_v46 }
  0x19   : > { %3529 = vmatpush3.bf16.msra.mxu0 %v3528_v33  ;;  %v3564_v51 = vpack.c.bf16 %v303_v45, %v302_v44  ;;  %v272_v53 = vld [vmem:[%s6523_s1 + $0x40] sm:$0xff]  ;;  %v273_v54 = vld [vmem:[%s6523_s1 + $0x48] sm:$0xff]  ;;  %v3566_v56 = vpack.c.bf16 %v321_v50, %v320_v49  ;;  %v290_v58 = vld [vmem:[%s6523_s1 + $0xd0] sm:$0xff] }
  0x1a   : > { %3531 = vmatprep.subr.bf16.mxu0 %v3530_v39  ;;  %v304_v55 = vld [vmem:[%s6523_s1 + $0x140] sm:$0xff]  ;;  %v305_v57 = vld [vmem:[%s6523_s1 + $0x148] sm:$0xff]  ;;  %v291_v59 = vld [vmem:[%s6523_s1 + $0xd8] sm:$0xff]  ;;  %v3536_v62 = vpack.c.bf16 %v273_v54, %v272_v53 }
  0x1b   : > { %3561 = vmatpush3.bf16.msra.mxu1 %v3560_v38  ;;  %v322_v60 = vld [vmem:[%s6523_s1 + $0x1d0] sm:$0xff]  ;;  %v323_v61 = vld [vmem:[%s6523_s1 + $0x1d8] sm:$0xff]  ;;  %v3568_v63 = vpack.c.bf16 %v305_v57, %v304_v55  ;;  %v3538_v0 = vpack.c.bf16 %v291_v59, %v290_v58  ;;  %v292_v6 = vld [vmem:[%s6523_s1 + $0xe0] sm:$0xff] }
  0x1c   : > { %3563 = vmatprep.subr.bf16.mxu1 %v3562_v43  ;;  %v274_v1 = vld [vmem:[%s6523_s1 + $0x50] sm:$0xff]  ;;  %v275_v2 = vld [vmem:[%s6523_s1 + $0x58] sm:$0xff]  ;;  %v3570_v4 = vpack.c.bf16 %v323_v61, %v322_v60  ;;  %v293_v7 = vld [vmem:[%s6523_s1 + $0xe8] sm:$0xff] }
  0x1d   : > { %3533 = vmatpush3.bf16.msra.mxu0 %v3532_v48  ;;  %v306_v3 = vld [vmem:[%s6523_s1 + $0x150] sm:$0xff]  ;;  %v307_v5 = vld [vmem:[%s6523_s1 + $0x158] sm:$0xff]  ;;  %v324_v8 = vld [vmem:[%s6523_s1 + $0x1e0] sm:$0xff]  ;;  %v3540_v10 = vpack.c.bf16 %v275_v2, %v274_v1  ;;  %v3542_v14 = vpack.c.bf16 %v293_v7, %v292_v6 }
  0x1e   : > { %3535 = vmatprep.subr.bf16.mxu0 %v3534_v52  ;;  %v325_v9 = vld [vmem:[%s6523_s1 + $0x1e8] sm:$0xff]  ;;  %v276_v11 = vld [vmem:[%s6523_s1 + $0x60] sm:$0xff]  ;;  %v3572_v13 = vpack.c.bf16 %v307_v5, %v306_v3  ;;  %v294_v19 = vld [vmem:[%s6523_s1 + $0xf0] sm:$0xff] }
  0x1f   : > { %3565 = vmatpush3.bf16.msra.mxu1 %v3564_v51  ;;  %v277_v12 = vld [vmem:[%s6523_s1 + $0x68] sm:$0xff]  ;;  %v308_v15 = vld [vmem:[%s6523_s1 + $0x160] sm:$0xff]  ;;  %v3574_v18 = vpack.c.bf16 %v325_v9, %v324_v8  ;;  %v295_v20 = vld [vmem:[%s6523_s1 + $0xf8] sm:$0xff] }
  0x20   : > { %3567 = vmatprep.subr.bf16.mxu1 %v3566_v56  ;;  %v309_v16 = vld [vmem:[%s6523_s1 + $0x168] sm:$0xff]  ;;  %v252_v17 = vld [vmem:[%s4144_s15] sm:$0xff]  ;;  %v326_v23 = vld [vmem:[%s6523_s1 + $0x1f0] sm:$0xff]  ;;  %v3544_v26 = vpack.c.bf16 %v277_v12, %v276_v11  ;;  %v3546_v28 = vpack.c.bf16 %v295_v20, %v294_v19 }
  0x21   : > { %3537 = vmatpush3.bf16.msra.mxu0 %v3536_v62  ;;  %v667_v21 = vcombine.high %v252_v17, %v252_v17  ;;  %v253_v22 = vld [vmem:[%s4144_s15 + $0x8] sm:$0xff]  ;;  %v327_v24 = vld [vmem:[%s6523_s1 + $0x1f8] sm:$0xff]  ;;  %v3576_v27 = vpack.c.bf16 %v309_v16, %v308_v15  ;;  %v278_v29 = vld [vmem:[%s6523_s1 + $0x70] sm:$0xff] }
  0x22   : > { %3539 = vmatprep.subr.bf16.mxu0 %v3538_v0  ;;  %v668_v25 = vcombine.high %v253_v22, %v253_v22  ;;  %v279_v30 = vld [vmem:[%s6523_s1 + $0x78] sm:$0xff]  ;;  %v310_v31 = vld [vmem:[%s6523_s1 + $0x170] sm:$0xff]  ;;  %v3578_v32 = vpack.c.bf16 %v327_v24, %v326_v23  ;;  %v344_v34 = vld [vmem:[%s6523_s1 + $0x280] sm:$0xff] }
  0x23   : > { %3569 = vmatpush3.bf16.msra.mxu1 %v3568_v63  ;;  %755 = vmatprep.mubr.f32.mxu0 %v667_v21  ;;  %v311_v33 = vld [vmem:[%s6523_s1 + $0x178] sm:$0xff]  ;;  %v345_v35 = vld [vmem:[%s6523_s1 + $0x288] sm:$0xff]  ;;  %v376_v36 = vld [vmem:[%s6523_s1 + $0x380] sm:$0xff]  ;;  %v3548_v38 = vpack.c.bf16 %v279_v30, %v278_v29 }
  0x24   : > { %3571 = vmatprep.subr.bf16.mxu1 %v3570_v4  ;;  %825 = vmatprep.mubr.f32.mxu1 %v668_v25  ;;  %v377_v37 = vld [vmem:[%s6523_s1 + $0x388] sm:$0xff]  ;;  %v3580_v39 = vpack.c.bf16 %v311_v33, %v310_v31  ;;  %v3582_v40 = vpack.c.bf16 %v345_v35, %v344_v34  ;;  %v328_v41 = vld [vmem:[%s6523_s1 + $0x200] sm:$0xff]  ;;  %v346_v46 = vld [vmem:[%s6523_s1 + $0x290] sm:$0xff] }
  0x25   : > { %3541 = vmatpush3.bf16.msra.mxu0 %v3540_v10  ;;  %v329_v42 = vld [vmem:[%s6523_s1 + $0x208] sm:$0xff]  ;;  %v360_v43 = vld [vmem:[%s6523_s1 + $0x300] sm:$0xff]  ;;  %v3614_v44 = vpack.c.bf16 %v377_v37, %v376_v36  ;;  %v347_v47 = vld [vmem:[%s6523_s1 + $0x298] sm:$0xff] }
  0x26   : > { %3543 = vmatprep.subr.bf16.mxu0 %v3542_v14  ;;  %v361_v45 = vld [vmem:[%s6523_s1 + $0x308] sm:$0xff]  ;;  %v378_v48 = vld [vmem:[%s6523_s1 + $0x390] sm:$0xff]  ;;  %v379_v49 = vld [vmem:[%s6523_s1 + $0x398] sm:$0xff]  ;;  %v3584_v50 = vpack.c.bf16 %v329_v42, %v328_v41  ;;  %v3586_v52 = vpack.c.bf16 %v347_v47, %v346_v46 }
  0x27   : > { %3573 = vmatpush3.bf16.msra.mxu1 %v3572_v13  ;;  %v3616_v51 = vpack.c.bf16 %v361_v45, %v360_v43  ;;  %v330_v53 = vld [vmem:[%s6523_s1 + $0x210] sm:$0xff]  ;;  %v331_v54 = vld [vmem:[%s6523_s1 + $0x218] sm:$0xff]  ;;  %v3618_v56 = vpack.c.bf16 %v379_v49, %v378_v48  ;;  %v348_v58 = vld [vmem:[%s6523_s1 + $0x2a0] sm:$0xff] }
  0x28   : > { %3575 = vmatprep.subr.bf16.mxu1 %v3574_v18  ;;  %v362_v55 = vld [vmem:[%s6523_s1 + $0x310] sm:$0xff]  ;;  %v363_v57 = vld [vmem:[%s6523_s1 + $0x318] sm:$0xff]  ;;  %v349_v59 = vld [vmem:[%s6523_s1 + $0x2a8] sm:$0xff]  ;;  %v3588_v62 = vpack.c.bf16 %v331_v54, %v330_v53 }
  0x29   : > { %3545 = vmatpush3.bf16.msra.mxu0 %v3544_v26  ;;  %v380_v60 = vld [vmem:[%s6523_s1 + $0x3a0] sm:$0xff]  ;;  %v381_v61 = vld [vmem:[%s6523_s1 + $0x3a8] sm:$0xff]  ;;  %v3620_v63 = vpack.c.bf16 %v363_v57, %v362_v55  ;;  %v3590_v0 = vpack.c.bf16 %v349_v59, %v348_v58  ;;  %v350_v6 = vld [vmem:[%s6523_s1 + $0x2b0] sm:$0xff] }
  0x2a   : > { %3547 = vmatprep.subr.bf16.mxu0 %v3546_v28  ;;  %v332_v1 = vld [vmem:[%s6523_s1 + $0x220] sm:$0xff]  ;;  %v333_v2 = vld [vmem:[%s6523_s1 + $0x228] sm:$0xff]  ;;  %v3622_v4 = vpack.c.bf16 %v381_v61, %v380_v60  ;;  %v351_v7 = vld [vmem:[%s6523_s1 + $0x2b8] sm:$0xff] }
  0x2b   : > { %3577 = vmatpush3.bf16.msra.mxu1 %v3576_v27  ;;  %v364_v3 = vld [vmem:[%s6523_s1 + $0x320] sm:$0xff]  ;;  %v365_v5 = vld [vmem:[%s6523_s1 + $0x328] sm:$0xff]  ;;  %v382_v8 = vld [vmem:[%s6523_s1 + $0x3b0] sm:$0xff]  ;;  %v3592_v10 = vpack.c.bf16 %v333_v2, %v332_v1  ;;  %v3594_v12 = vpack.c.bf16 %v351_v7, %v350_v6 }
  0x2c   : > { %3579 = vmatprep.subr.bf16.mxu1 %v3578_v32  ;;  %v383_v9 = vld [vmem:[%s6523_s1 + $0x3b8] sm:$0xff]  ;;  %v3624_v11 = vpack.c.bf16 %v365_v5, %v364_v3  ;;  %v334_v13 = vld [vmem:[%s6523_s1 + $0x230] sm:$0xff]  ;;  %v352_v18 = vld [vmem:[%s6523_s1 + $0x2c0] sm:$0xff] }
  0x2d   : > { %3549 = vmatpush3.bf16.msra.mxu0 %v3548_v38  ;;  %v335_v14 = vld [vmem:[%s6523_s1 + $0x238] sm:$0xff]  ;;  %v366_v15 = vld [vmem:[%s6523_s1 + $0x330] sm:$0xff]  ;;  %v3626_v16 = vpack.c.bf16 %v383_v9, %v382_v8  ;;  %v353_v19 = vld [vmem:[%s6523_s1 + $0x2c8] sm:$0xff] }
  0x2e   : > { %3583 = vmatprep.subr.bf16.mxu0 %v3582_v40  ;;  %v384_v20 = vld [vmem:[%s6523_s1 + $0x3c0] sm:$0xff]  ;;  %v385_v21 = vld [vmem:[%s6523_s1 + $0x3c8] sm:$0xff]  ;;  %v3596_v23 = vpack.c.bf16 %v335_v14, %v334_v13  ;;  %v4304_v25 = vld [vmem:[%s4144_s15 + $0x18] sm:$0xff]  ;;  %v3598_v27 = vpack.c.bf16 %v353_v19, %v352_v18 }
  0x2f   : > { %3581 = vmatpush3.bf16.msra.mxu1 %v3580_v39  ;;  %v336_v28 = vld [vmem:[%s6523_s1 + $0x240] sm:$0xff]  ;;  %v337_v29 = vld [vmem:[%s6523_s1 + $0x248] sm:$0xff]  ;;  %v670_v31 = vcombine.high %v4304_v25, %v4304_v25  ;;  %v3630_v32 = vpack.c.bf16 %v385_v21, %v384_v20  ;;  %v354_v34 = vld [vmem:[%s6523_s1 + $0x2d0] sm:$0xff] }
  0x30   : > { %3615 = vmatprep.subr.bf16.mxu1 %v3614_v44  ;;  %756 = vmatmul.mubr.f32.vlgmr.msra.gmra.mrb[0].mxu0 %v252_v17  ;;  %v367_v17 = vld [vmem:[%s6523_s1 + $0x338] sm:$0xff]  ;;  %v368_v30 = vld [vmem:[%s6523_s1 + $0x340] sm:$0xff]  ;;  %v369_v33 = vld [vmem:[%s6523_s1 + $0x348] sm:$0xff]  ;;  %v3600_v38 = vpack.c.bf16 %v337_v29, %v336_v28 }
  0x31   : > { %3585 = vmatpush3.bf16.msra.mxu0 %v3584_v50  ;;  %v3628_v26 = vpack.c.bf16 %v367_v17, %v366_v15  ;;  %v355_v35 = vld [vmem:[%s6523_s1 + $0x2d8] sm:$0xff]  ;;  %v386_v36 = vld [vmem:[%s6523_s1 + $0x3d0] sm:$0xff]  ;;  %v3632_v39 = vpack.c.bf16 %v369_v33, %v368_v30  ;;  %v356_v46 = vld [vmem:[%s6523_s1 + $0x2e0] sm:$0xff] }
  0x32   : > { %826 = vmatmul.mubr.f32.vlgmr.msra.gmra.mrb[0].mxu1 %v253_v22  ;;  %3587 = vmatprep.subr.bf16.mxu0 %v3586_v52  ;;  %v4299_v22 = vld [vmem:[%s4144_s15 + $0x10] sm:$0xff]  ;;  %v387_v37 = vld [vmem:[%s6523_s1 + $0x3d8] sm:$0xff]  ;;  %v3602_v40 = vpack.c.bf16 %v355_v35, %v354_v34  ;;  %v357_v47 = vld [vmem:[%s6523_s1 + $0x2e8] sm:$0xff] }
  0x33   : > { %3617 = vmatpush3.bf16.msra.mxu1 %v3616_v51  ;;  %v669_v24 = vcombine.high %v4299_v22, %v4299_v22  ;;  %965 = vmatprep.mubr.f32.mxu1 %v670_v31  ;;  %v338_v41 = vld [vmem:[%s6523_s1 + $0x250] sm:$0xff]  ;;  %v339_v42 = vld [vmem:[%s6523_s1 + $0x258] sm:$0xff]  ;;  %v3634_v44 = vpack.c.bf16 %v387_v37, %v386_v36  ;;  %v388_v48 = vld [vmem:[%s6523_s1 + $0x3e0] sm:$0xff]  ;;  %v3606_v52 = vpack.c.bf16 %v357_v47, %v356_v46 }
  0x34   : > { %3619 = vmatprep.subr.bf16.mxu1 %v3618_v56  ;;  %v370_v43 = vld [vmem:[%s6523_s1 + $0x350] sm:$0xff]  ;;  %v371_v45 = vld [vmem:[%s6523_s1 + $0x358] sm:$0xff]  ;;  %v389_v49 = vld [vmem:[%s6523_s1 + $0x3e8] sm:$0xff]  ;;  %v3604_v50 = vpack.c.bf16 %v339_v42, %v338_v41 }
  0x35   : > { %3589 = vmatpush3.bf16.msra.mxu0 %v3588_v62  ;;  %895 = vmatprep.mubr.f32.mxu0 %v669_v24  ;;  %v3636_v51 = vpack.c.bf16 %v371_v45, %v370_v43  ;;  %v340_v53 = vld [vmem:[%s6523_s1 + $0x260] sm:$0xff]  ;;  %v341_v54 = vld [vmem:[%s6523_s1 + $0x268] sm:$0xff]  ;;  %v3638_v56 = vpack.c.bf16 %v389_v49, %v388_v48  ;;  %v358_v58 = vld [vmem:[%s6523_s1 + $0x2f0] sm:$0xff] }
  0x36   : > { %3591 = vmatprep.subr.bf16.mxu0 %v3590_v0  ;;  %v372_v55 = vld [vmem:[%s6523_s1 + $0x360] sm:$0xff]  ;;  %v373_v57 = vld [vmem:[%s6523_s1 + $0x368] sm:$0xff]  ;;  %v359_v59 = vld [vmem:[%s6523_s1 + $0x2f8] sm:$0xff]  ;;  %v3608_v62 = vpack.c.bf16 %v341_v54, %v340_v53 }
  0x37   : > { %3621 = vmatpush3.bf16.msra.mxu1 %v3620_v63  ;;  %v390_v60 = vld [vmem:[%s6523_s1 + $0x3f0] sm:$0xff]  ;;  %v391_v61 = vld [vmem:[%s6523_s1 + $0x3f8] sm:$0xff]  ;;  %v3640_v63 = vpack.c.bf16 %v373_v57, %v372_v55  ;;  %v3610_v0 = vpack.c.bf16 %v359_v59, %v358_v58  ;;  %v408_v6 = vld [vmem:[%s6523_s1 + $0x480] sm:$0xff] }
  0x38   : > { %3623 = vmatprep.subr.bf16.mxu1 %v3622_v4  ;;  %v342_v1 = vld [vmem:[%s6523_s1 + $0x270] sm:$0xff]  ;;  %v343_v2 = vld [vmem:[%s6523_s1 + $0x278] sm:$0xff]  ;;  %v3642_v4 = vpack.c.bf16 %v391_v61, %v390_v60  ;;  %v409_v7 = vld [vmem:[%s6523_s1 + $0x488] sm:$0xff] }
  0x39   : > { %3593 = vmatpush3.bf16.msra.mxu0 %v3592_v10  ;;  %v374_v3 = vld [vmem:[%s6523_s1 + $0x370] sm:$0xff]  ;;  %v375_v5 = vld [vmem:[%s6523_s1 + $0x378] sm:$0xff]  ;;  %v440_v8 = vld [vmem:[%s6523_s1 + $0x580] sm:$0xff]  ;;  %v3612_v10 = vpack.c.bf16 %v343_v2, %v342_v1 }
  0x3a   : > { %3595 = vmatprep.subr.bf16.mxu0 %v3594_v12  ;;  %v441_v9 = vld [vmem:[%s6523_s1 + $0x588] sm:$0xff]  ;;  %v3646_v12 = vpack.c.bf16 %v409_v7, %v408_v6  ;;  %v392_v13 = vld [vmem:[%s6523_s1 + $0x400] sm:$0xff]  ;;  %v410_v18 = vld [vmem:[%s6523_s1 + $0x490] sm:$0xff] }
  0x3b   : > { %3625 = vmatpush3.bf16.msra.mxu1 %v3624_v11  ;;  %v3644_v11 = vpack.c.bf16 %v375_v5, %v374_v3  ;;  %v393_v14 = vld [vmem:[%s6523_s1 + $0x408] sm:$0xff]  ;;  %v424_v15 = vld [vmem:[%s6523_s1 + $0x500] sm:$0xff]  ;;  %v411_v19 = vld [vmem:[%s6523_s1 + $0x498] sm:$0xff] }
  0x3c   : > { %3627 = vmatprep.subr.bf16.mxu1 %v3626_v16  ;;  %v3678_v16 = vpack.c.bf16 %v441_v9, %v440_v8  ;;  %v425_v17 = vld [vmem:[%s6523_s1 + $0x508] sm:$0xff]  ;;  %v442_v20 = vld [vmem:[%s6523_s1 + $0x590] sm:$0xff]  ;;  %v443_v21 = vld [vmem:[%s6523_s1 + $0x598] sm:$0xff]  ;;  %v3650_v28 = vpack.c.bf16 %v411_v19, %v410_v18 }
  0x3d   : > { %3597 = vmatpush3.bf16.msra.mxu0 %v3596_v23  ;;  %v3648_v23 = vpack.c.bf16 %v393_v14, %v392_v13  ;;  %v394_v24 = vld [vmem:[%s6523_s1 + $0x410] sm:$0xff]  ;;  %v427_v30 = vld [vmem:[%s6523_s1 + $0x518] sm:$0xff]  ;;  %v4441_v31 = vld [vmem:[%s4144_s15 + $0x20] sm:$0xff] }
  0x3e   : > { %3599 = vmatprep.subr.bf16.mxu0 %v3598_v27  ;;  %v3680_v27 = vpack.c.bf16 %v425_v17, %v424_v15  ;;  %v426_v29 = vld [vmem:[%s6523_s1 + $0x510] sm:$0xff]  ;;  %v412_v33 = vld [vmem:[%s6523_s1 + $0x4a0] sm:$0xff]  ;;  %v413_v34 = vld [vmem:[%s6523_s1 + $0x4a8] sm:$0xff]  ;;  %v671_v35 = vcombine.high %v4441_v31, %v4441_v31 }
  0x3f   : > { %3629 = vmatpush3.bf16.msra.mxu1 %v3628_v26  ;;  %v395_v26 = vld [vmem:[%s6523_s1 + $0x418] sm:$0xff]  ;;  %v4452_v36 = vld [vmem:[%s4144_s15 + $0x28] sm:$0xff]  ;;  %v444_v37 = vld [vmem:[%s6523_s1 + $0x5a0] sm:$0xff]  ;;  %v3684_v41 = vpack.c.bf16 %v427_v30, %v426_v29  ;;  %v3654_v42 = vpack.c.bf16 %v413_v34, %v412_v33 }
  0x40   : > { %3631 = vmatprep.subr.bf16.mxu1 %v3630_v32  ;;  %v3682_v32 = vpack.c.bf16 %v443_v21, %v442_v20  ;;  %v397_v43 = vld [vmem:[%s6523_s1 + $0x428] sm:$0xff]  ;;  %v414_v46 = vld [vmem:[%s6523_s1 + $0x4b0] sm:$0xff]  ;;  %v415_v47 = vld [vmem:[%s6523_s1 + $0x4b8] sm:$0xff] }
  0x41   : > { %3601 = vmatpush3.bf16.msra.mxu0 %v3600_v38  ;;  %v445_v38 = vld [vmem:[%s6523_s1 + $0x5a8] sm:$0xff]  ;;  %v446_v48 = vld [vmem:[%s6523_s1 + $0x5b0] sm:$0xff]  ;;  %v447_v49 = vld [vmem:[%s6523_s1 + $0x5b8] sm:$0xff] }
  0x42   : > { %3603 = vmatprep.subr.bf16.mxu0 %v3602_v40  ;;  %v3652_v40 = vpack.c.bf16 %v395_v26, %v394_v24  ;;  %v3686_v45 = vpack.c.bf16 %v445_v38, %v444_v37  ;;  %v398_v53 = vld [vmem:[%s6523_s1 + $0x430] sm:$0xff]  ;;  %v399_v54 = vld [vmem:[%s6523_s1 + $0x438] sm:$0xff]  ;;  %v416_v58 = vld [vmem:[%s6523_s1 + $0x4c0] sm:$0xff] }
  0x43   : > { %3633 = vmatpush3.bf16.msra.mxu1 %v3632_v39  ;;  %v672_v39 = vcombine.high %v4452_v36, %v4452_v36  ;;  %v430_v55 = vld [vmem:[%s6523_s1 + $0x530] sm:$0xff]  ;;  %v431_v57 = vld [vmem:[%s6523_s1 + $0x538] sm:$0xff]  ;;  %v417_v59 = vld [vmem:[%s6523_s1 + $0x4c8] sm:$0xff] }
  0x44   : > { %3635 = vmatprep.subr.bf16.mxu1 %v3634_v44  ;;  %v428_v44 = vld [vmem:[%s6523_s1 + $0x520] sm:$0xff]  ;;  %v449_v61 = vld [vmem:[%s6523_s1 + $0x5c8] sm:$0xff]  ;;  %v418_v6 = vld [vmem:[%s6523_s1 + $0x4d0] sm:$0xff] }
  0x45   : > { %3605 = vmatpush3.bf16.msra.mxu0 %v3604_v50  ;;  %v448_v60 = vld [vmem:[%s6523_s1 + $0x5c0] sm:$0xff]  ;;  %v401_v2 = vld [vmem:[%s6523_s1 + $0x448] sm:$0xff]  ;;  %v419_v7 = vld [vmem:[%s6523_s1 + $0x4d8] sm:$0xff] }
  0x46   : > { %3607 = vmatprep.subr.bf16.mxu0 %v3606_v52  ;;  %v3658_v52 = vpack.c.bf16 %v415_v47, %v414_v46  ;;  %v400_v1 = vld [vmem:[%s6523_s1 + $0x440] sm:$0xff]  ;;  %v433_v5 = vld [vmem:[%s6523_s1 + $0x548] sm:$0xff]  ;;  %v450_v8 = vld [vmem:[%s6523_s1 + $0x5d0] sm:$0xff] }
  0x47   : > { %3637 = vmatpush3.bf16.msra.mxu1 %v3636_v51  ;;  %v432_v3 = vld [vmem:[%s6523_s1 + $0x540] sm:$0xff]  ;;  %v451_v9 = vld [vmem:[%s6523_s1 + $0x5d8] sm:$0xff]  ;;  %v402_v13 = vld [vmem:[%s6523_s1 + $0x450] sm:$0xff] }
  0x48   : > { %3639 = vmatprep.subr.bf16.mxu1 %v3638_v56  ;;  %v3690_v56 = vpack.c.bf16 %v447_v49, %v446_v48  ;;  %v403_v14 = vld [vmem:[%s6523_s1 + $0x458] sm:$0xff]  ;;  %v434_v15 = vld [vmem:[%s6523_s1 + $0x550] sm:$0xff]  ;;  %v420_v18 = vld [vmem:[%s6523_s1 + $0x4e0] sm:$0xff] }
  0x49   : > { %3609 = vmatpush3.bf16.msra.mxu0 %v3608_v62  ;;  %v3660_v62 = vpack.c.bf16 %v399_v54, %v398_v53  ;;  %v435_v17 = vld [vmem:[%s6523_s1 + $0x558] sm:$0xff]  ;;  %v421_v19 = vld [vmem:[%s6523_s1 + $0x4e8] sm:$0xff]  ;;  %v452_v20 = vld [vmem:[%s6523_s1 + $0x5e0] sm:$0xff] }
  0x4a   : > { %3611 = vmatprep.subr.bf16.mxu0 %v3610_v0  ;;  %v3662_v0 = vpack.c.bf16 %v417_v59, %v416_v58  ;;  %v453_v21 = vld [vmem:[%s6523_s1 + $0x5e8] sm:$0xff]  ;;  %v3700_v24 = vpack.c.bf16 %v435_v17, %v434_v15  ;;  %v3670_v26 = vpack.c.bf16 %v421_v19, %v420_v18  ;;  %v436_v29 = vld [vmem:[%s6523_s1 + $0x560] sm:$0xff]  ;;  %v422_v33 = vld [vmem:[%s6523_s1 + $0x4f0] sm:$0xff] }
  0x4b   : > { %3641 = vmatpush3.bf16.msra.mxu1 %v3640_v63  ;;  %v3692_v63 = vpack.c.bf16 %v431_v57, %v430_v55  ;;  %v3702_v30 = vpack.c.bf16 %v453_v21, %v452_v20  ;;  %v423_v34 = vld [vmem:[%s6523_s1 + $0x4f8] sm:$0xff]  ;;  %v504_v46 = vld [vmem:[%s6523_s1 + $0x780] sm:$0xff]  ;;  %v505_v47 = vld [vmem:[%s6523_s1 + $0x788] sm:$0xff] }
  0x4c   : > { %3643 = vmatprep.subr.bf16.mxu1 %v3642_v4  ;;  %v3694_v4 = vpack.c.bf16 %v449_v61, %v448_v60  ;;  %v455_v37 = vld [vmem:[%s6523_s1 + $0x5f8] sm:$0xff]  ;;  %v488_v53 = vld [vmem:[%s6523_s1 + $0x700] sm:$0xff]  ;;  %v3742_v54 = vpack.c.bf16 %v505_v47, %v504_v46  ;;  %v489_v55 = vld [vmem:[%s6523_s1 + $0x708] sm:$0xff] }
  0x4d   : > { %3613 = vmatpush3.bf16.msra.mxu0 %v3612_v10  ;;  %v3664_v10 = vpack.c.bf16 %v401_v2, %v400_v1  ;;  %v475_v57 = vld [vmem:[%s6523_s1 + $0x698] sm:$0xff]  ;;  %v506_v58 = vld [vmem:[%s6523_s1 + $0x790] sm:$0xff]  ;;  %v461_v15 = vld [vmem:[%s6523_s1 + $0x628] sm:$0xff] }
  0x4e   : > { %3647 = vmatprep.subr.bf16.mxu0 %v3646_v12  ;;  %v3666_v12 = vpack.c.bf16 %v419_v7, %v418_v6  ;;  %v507_v59 = vld [vmem:[%s6523_s1 + $0x798] sm:$0xff]  ;;  %v4633_v60 = vld [vmem:[%s4144_s15 + $0x30] sm:$0xff]  ;;  %v476_v6 = vld [vmem:[%s6523_s1 + $0x6a0] sm:$0xff] }
  0x4f   : > { %3645 = vmatpush3.bf16.msra.mxu1 %v3644_v11  ;;  %v3696_v11 = vpack.c.bf16 %v433_v5, %v432_v3  ;;  %v458_v1 = vld [vmem:[%s6523_s1 + $0x610] sm:$0xff]  ;;  %v459_v2 = vld [vmem:[%s6523_s1 + $0x618] sm:$0xff]  ;;  %v477_v7 = vld [vmem:[%s6523_s1 + $0x6a8] sm:$0xff] }
  0x50   : > { %3679 = vmatprep.subr.bf16.mxu1 %v3678_v16  ;;  %896 = vmatmul.mubr.f32.vlgmr.msra.gmra.mrb[2].mxu0 %v4299_v22  ;;  %v396_v22 = vld [vmem:[%s6523_s1 + $0x420] sm:$0xff]  ;;  %v3698_v16 = vpack.c.bf16 %v451_v9, %v450_v8  ;;  %v490_v3 = vld [vmem:[%s6523_s1 + $0x710] sm:$0xff]  ;;  %v491_v5 = vld [vmem:[%s6523_s1 + $0x718] sm:$0xff]  ;;  %v673_v8 = vcombine.high %v4633_v60, %v4633_v60 }
  0x51   : > { %3649 = vmatpush3.bf16.msra.mxu0 %v3648_v23  ;;  %1035 = vmatprep.mubr.f32.mxu0 %v671_v35  ;;  %v3656_v50 = vpack.c.bf16 %v397_v43, %v396_v22  ;;  %v3668_v23 = vpack.c.bf16 %v403_v14, %v402_v13  ;;  %v454_v35 = vld [vmem:[%s6523_s1 + $0x5f0] sm:$0xff]  ;;  %v508_v9 = vld [vmem:[%s6523_s1 + $0x7a0] sm:$0xff]  ;;  %v3748_v13 = vpack.c.bf16 %v491_v5, %v490_v3  ;;  %v479_v19 = vld [vmem:[%s6523_s1 + $0x6b8] sm:$0xff] }
  0x52   : > { %966 = vmatmul.mubr.f32.vlgmr.msra.gmra.mrb[2].mxu1 %v4304_v25  ;;  %3651 = vmatprep.subr.bf16.mxu0 %v3650_v28  ;;  %v429_v25 = vld [vmem:[%s6523_s1 + $0x528] sm:$0xff]  ;;  %v438_v22 = vld [vmem:[%s6523_s1 + $0x570] sm:$0xff]  ;;  %v3706_v43 = vpack.c.bf16 %v455_v37, %v454_v35  ;;  %v3718_v14 = vpack.c.bf16 %v477_v7, %v476_v6  ;;  %v511_v21 = vld [vmem:[%s6523_s1 + $0x7b8] sm:$0xff] }
  0x53   : > { %3681 = vmatpush3.bf16.msra.mxu1 %v3680_v27  ;;  %1105 = vmatprep.mubr.f32.mxu1 %v672_v39  ;;  %v3688_v51 = vpack.c.bf16 %v429_v25, %v428_v44  ;;  %v404_v27 = vld [vmem:[%s6523_s1 + $0x460] sm:$0xff]  ;;  %v405_v28 = vld [vmem:[%s6523_s1 + $0x468] sm:$0xff]  ;;  %v439_v44 = vld [vmem:[%s6523_s1 + $0x578] sm:$0xff] }
  0x54   : > { %3683 = vmatprep.subr.bf16.mxu1 %v3682_v32  ;;  %v437_v32 = vld [vmem:[%s6523_s1 + $0x568] sm:$0xff]  ;;  %v3672_v38 = vpack.c.bf16 %v405_v28, %v404_v27  ;;  %v3708_v49 = vpack.c.bf16 %v439_v44, %v438_v22  ;;  %v478_v18 = vld [vmem:[%s6523_s1 + $0x6b0] sm:$0xff]  ;;  %v463_v28 = vld [vmem:[%s6523_s1 + $0x638] sm:$0xff] }
  0x55   : > { %3653 = vmatpush3.bf16.msra.mxu0 %v3652_v40  ;;  %v3704_v39 = vpack.c.bf16 %v437_v32, %v436_v29  ;;  %v3674_v40 = vpack.c.bf16 %v423_v34, %v422_v33  ;;  %v473_v25 = vld [vmem:[%s6523_s1 + $0x688] sm:$0xff]  ;;  %v510_v20 = vld [vmem:[%s6523_s1 + $0x7b0] sm:$0xff]  ;;  %v495_v32 = vld [vmem:[%s6523_s1 + $0x738] sm:$0xff] }
  0x56   : > { %3655 = vmatprep.subr.bf16.mxu0 %v3654_v42  ;;  %v407_v42 = vld [vmem:[%s6523_s1 + $0x478] sm:$0xff]  ;;  %v462_v27 = vld [vmem:[%s6523_s1 + $0x630] sm:$0xff]  ;;  %v480_v33 = vld [vmem:[%s6523_s1 + $0x6c0] sm:$0xff] }
  0x57   : > { %3685 = vmatpush3.bf16.msra.mxu1 %v3684_v41  ;;  %v406_v41 = vld [vmem:[%s6523_s1 + $0x470] sm:$0xff]  ;;  %v481_v34 = vld [vmem:[%s6523_s1 + $0x6c8] sm:$0xff]  ;;  %v512_v35 = vld [vmem:[%s6523_s1 + $0x7c0] sm:$0xff] }
  0x58   : > { %3687 = vmatprep.subr.bf16.mxu1 %v3686_v45  ;;  %v472_v45 = vld [vmem:[%s6523_s1 + $0x680] sm:$0xff]  ;;  %v3676_v48 = vpack.c.bf16 %v407_v42, %v406_v41  ;;  %v494_v29 = vld [vmem:[%s6523_s1 + $0x730] sm:$0xff]  ;;  %v513_v37 = vld [vmem:[%s6523_s1 + $0x7c8] sm:$0xff] }
  0x59   : > { %3657 = vmatpush3.bf16.msra.mxu0 %v3656_v50  ;;  %v3710_v50 = vpack.c.bf16 %v473_v25, %v472_v45  ;;  %v464_v41 = vld [vmem:[%s6523_s1 + $0x640] sm:$0xff]  ;;  %v465_v42 = vld [vmem:[%s6523_s1 + $0x648] sm:$0xff]  ;;  %v482_v45 = vld [vmem:[%s6523_s1 + $0x6d0] sm:$0xff] }
  0x5a   : > { %3659 = vmatprep.subr.bf16.mxu0 %v3658_v52  ;;  %v457_v52 = vld [vmem:[%s6523_s1 + $0x608] sm:$0xff]  ;;  %v496_v22 = vld [vmem:[%s6523_s1 + $0x740] sm:$0xff]  ;;  %v483_v25 = vld [vmem:[%s6523_s1 + $0x6d8] sm:$0xff] }
  0x5b   : > { %3689 = vmatpush3.bf16.msra.mxu1 %v3688_v51  ;;  %v456_v51 = vld [vmem:[%s6523_s1 + $0x600] sm:$0xff]  ;;  %v497_v44 = vld [vmem:[%s6523_s1 + $0x748] sm:$0xff]  ;;  %v514_v46 = vld [vmem:[%s6523_s1 + $0x7d0] sm:$0xff] }
  0x5c   : > { %3691 = vmatprep.subr.bf16.mxu1 %v3690_v56  ;;  %v474_v56 = vld [vmem:[%s6523_s1 + $0x690] sm:$0xff]  ;;  %v3712_v61 = vpack.c.bf16 %v457_v52, %v456_v51  ;;  %v515_v47 = vld [vmem:[%s6523_s1 + $0x7d8] sm:$0xff]  ;;  %v500_v3 = vld [vmem:[%s6523_s1 + $0x760] sm:$0xff] }
  0x5d   : > { %3661 = vmatpush3.bf16.msra.mxu0 %v3660_v62  ;;  %v4636_v62 = vld [vmem:[%s4144_s15 + $0x38] sm:$0xff]  ;;  %v466_v51 = vld [vmem:[%s6523_s1 + $0x650] sm:$0xff]  ;;  %v501_v5 = vld [vmem:[%s6523_s1 + $0x768] sm:$0xff] }
  0x5e   : > { %3663 = vmatprep.subr.bf16.mxu0 %v3662_v0  ;;  %v3714_v0 = vpack.c.bf16 %v475_v57, %v474_v56  ;;  %v467_v52 = vld [vmem:[%s6523_s1 + $0x658] sm:$0xff]  ;;  %v484_v56 = vld [vmem:[%s6523_s1 + $0x6e0] sm:$0xff]  ;;  %v485_v57 = vld [vmem:[%s6523_s1 + $0x6e8] sm:$0xff] }
  0x5f   : > { %3693 = vmatpush3.bf16.msra.mxu1 %v3692_v63  ;;  %v3744_v63 = vpack.c.bf16 %v489_v55, %v488_v53  ;;  %v498_v53 = vld [vmem:[%s6523_s1 + $0x750] sm:$0xff]  ;;  %v499_v55 = vld [vmem:[%s6523_s1 + $0x758] sm:$0xff] }
  0x60   : > { %3695 = vmatprep.subr.bf16.mxu1 %v3694_v4  ;;  %v3746_v4 = vpack.c.bf16 %v507_v59, %v506_v58  ;;  %v516_v58 = vld [vmem:[%s6523_s1 + $0x7e0] sm:$0xff]  ;;  %v517_v59 = vld [vmem:[%s6523_s1 + $0x7e8] sm:$0xff]  ;;  %v486_v6 = vld [vmem:[%s6523_s1 + $0x6f0] sm:$0xff] }
  0x61   : > { %3665 = vmatpush3.bf16.msra.mxu0 %v3664_v10  ;;  %v509_v10 = vld [vmem:[%s6523_s1 + $0x7a8] sm:$0xff]  ;;  %v487_v7 = vld [vmem:[%s6523_s1 + $0x6f8] sm:$0xff] }
  0x62   : > { %3667 = vmatprep.subr.bf16.mxu0 %v3666_v12  ;;  %v3716_v12 = vpack.c.bf16 %v459_v2, %v458_v1  ;;  %v3750_v17 = vpack.c.bf16 %v509_v10, %v508_v9  ;;  %v468_v1 = vld [vmem:[%s6523_s1 + $0x660] sm:$0xff]  ;;  %v469_v2 = vld [vmem:[%s6523_s1 + $0x668] sm:$0xff]  ;;  %v519_v9 = vld [vmem:[%s6523_s1 + $0x7f8] sm:$0xff] }
  0x63   : > { %3697 = vmatpush3.bf16.msra.mxu1 %v3696_v11  ;;  %v674_v11 = vcombine.high %v4636_v62, %v4636_v62  ;;  %v3736_v10 = vpack.c.bf16 %v469_v2, %v468_v1  ;;  %v526_v1 = vld [vmem:[%s6523_s1 + $0x830] sm:$0xff]  ;;  %v527_v2 = vld [vmem:[%s6523_s1 + $0x838] sm:$0xff] }
  0x64   : > { %3699 = vmatprep.subr.bf16.mxu1 %v3698_v16  ;;  %v492_v16 = vld [vmem:[%s6523_s1 + $0x720] sm:$0xff] }
  0x65   : > { %3669 = vmatpush3.bf16.msra.mxu0 %v3668_v23 }
  0x66   : > { %3671 = vmatprep.subr.bf16.mxu0 %v3670_v26  ;;  %v3722_v26 = vpack.c.bf16 %v479_v19, %v478_v18  ;;  %v568_v18 = vld [vmem:[%s6523_s1 + $0x980] sm:$0xff]  ;;  %v569_v19 = vld [vmem:[%s6523_s1 + $0x988] sm:$0xff] }
  0x67   : > { %3701 = vmatpush3.bf16.msra.mxu1 %v3700_v24 }
  0x68   : > { %3703 = vmatprep.subr.bf16.mxu1 %v3702_v30  ;;  %v3754_v30 = vpack.c.bf16 %v511_v21, %v510_v20 }
  0x69   : > { %3673 = vmatpush3.bf16.msra.mxu0 %v3672_v38  ;;  %v3724_v38 = vpack.c.bf16 %v463_v28, %v462_v27  ;;  %v552_v27 = vld [vmem:[%s6523_s1 + $0x900] sm:$0xff]  ;;  %v3806_v28 = vpack.c.bf16 %v569_v19, %v568_v18  ;;  %v578_v18 = vld [vmem:[%s6523_s1 + $0x9d0] sm:$0xff]  ;;  %v579_v19 = vld [vmem:[%s6523_s1 + $0x9d8] sm:$0xff] }
  0x6a   : > { %3675 = vmatprep.subr.bf16.mxu0 %v3674_v40  ;;  %v3726_v40 = vpack.c.bf16 %v481_v34, %v480_v33  ;;  %v570_v33 = vld [vmem:[%s6523_s1 + $0x990] sm:$0xff]  ;;  %v571_v34 = vld [vmem:[%s6523_s1 + $0x998] sm:$0xff] }
  0x6b   : > { %3705 = vmatpush3.bf16.msra.mxu1 %v3704_v39  ;;  %v3756_v39 = vpack.c.bf16 %v495_v32, %v494_v29  ;;  %v553_v29 = vld [vmem:[%s6523_s1 + $0x908] sm:$0xff]  ;;  %v539_v32 = vld [vmem:[%s6523_s1 + $0x898] sm:$0xff] }
  0x6c   : > { %3707 = vmatprep.subr.bf16.mxu1 %v3706_v43  ;;  %v3758_v43 = vpack.c.bf16 %v513_v37, %v512_v35  ;;  %v4837_v35 = vld [vmem:[%s4144_s15 + $0x40] sm:$0xff] }
  0x6d   : > { %3677 = vmatpush3.bf16.msra.mxu0 %v3676_v48  ;;  %v3728_v48 = vpack.c.bf16 %v465_v42, %v464_v41  ;;  %v522_v41 = vld [vmem:[%s6523_s1 + $0x810] sm:$0xff]  ;;  %v523_v42 = vld [vmem:[%s6523_s1 + $0x818] sm:$0xff] }
  0x6e   : > { %3711 = vmatprep.subr.bf16.mxu0 %v3710_v50  ;;  %v3730_v50 = vpack.c.bf16 %v483_v25, %v482_v45  ;;  %v540_v45 = vld [vmem:[%s6523_s1 + $0x8a0] sm:$0xff]  ;;  %v541_v25 = vld [vmem:[%s6523_s1 + $0x8a8] sm:$0xff] }
  0x6f   : > { %3709 = vmatpush3.bf16.msra.mxu1 %v3708_v49  ;;  %v3760_v49 = vpack.c.bf16 %v497_v44, %v496_v22  ;;  %v554_v22 = vld [vmem:[%s6523_s1 + $0x910] sm:$0xff]  ;;  %v555_v44 = vld [vmem:[%s6523_s1 + $0x918] sm:$0xff] }
  0x70   : > { %3743 = vmatprep.subr.bf16.mxu1 %v3742_v54  ;;  %1036 = vmatmul.mubr.f32.vlgmr.msra.gmra.mrb[4].mxu0 %v4441_v31  ;;  %v460_v31 = vld [vmem:[%s6523_s1 + $0x620] sm:$0xff]  ;;  %v3762_v54 = vpack.c.bf16 %v515_v47, %v514_v46  ;;  %v675_v46 = vcombine.high %v4837_v35, %v4837_v35 }
  0x71   : > { %3713 = vmatpush3.bf16.msra.mxu0 %v3712_v61  ;;  %1175 = vmatprep.mubr.f32.mxu0 %v673_v8  ;;  %v3720_v23 = vpack.c.bf16 %v461_v15, %v460_v31  ;;  %v3732_v61 = vpack.c.bf16 %v467_v52, %v466_v51  ;;  %v518_v8 = vld [vmem:[%s6523_s1 + $0x7f0] sm:$0xff]  ;;  %v572_v47 = vld [vmem:[%s6523_s1 + $0x9a0] sm:$0xff]  ;;  %v3812_v51 = vpack.c.bf16 %v555_v44, %v554_v22  ;;  %v565_v44 = vld [vmem:[%s6523_s1 + $0x968] sm:$0xff] }
  0x72   : > { %1106 = vmatmul.mubr.f32.vlgmr.msra.gmra.mrb[4].mxu1 %v4452_v36  ;;  %3715 = vmatprep.subr.bf16.mxu0 %v3714_v0  ;;  %v493_v36 = vld [vmem:[%s6523_s1 + $0x728] sm:$0xff]  ;;  %v3734_v0 = vpack.c.bf16 %v485_v57, %v484_v56  ;;  %v502_v31 = vld [vmem:[%s6523_s1 + $0x770] sm:$0xff]  ;;  %v3770_v15 = vpack.c.bf16 %v519_v9, %v518_v8  ;;  %v3782_v52 = vpack.c.bf16 %v541_v25, %v540_v45  ;;  %v543_v57 = vld [vmem:[%s6523_s1 + $0x8b8] sm:$0xff] }
  0x73   : > { %3745 = vmatpush3.bf16.msra.mxu1 %v3744_v63  ;;  %1245 = vmatprep.mubr.f32.mxu1 %v674_v11  ;;  %v3752_v24 = vpack.c.bf16 %v493_v36, %v492_v16  ;;  %v3764_v63 = vpack.c.bf16 %v499_v55, %v498_v53  ;;  %v3768_v11 = vpack.c.bf16 %v501_v5, %v500_v3  ;;  %v503_v16 = vld [vmem:[%s6523_s1 + $0x778] sm:$0xff]  ;;  %v537_v36 = vld [vmem:[%s6523_s1 + $0x888] sm:$0xff]  ;;  %v542_v56 = vld [vmem:[%s6523_s1 + $0x8b0] sm:$0xff] }
  0x74   : > { %3747 = vmatprep.subr.bf16.mxu1 %v3746_v4  ;;  %v3766_v4 = vpack.c.bf16 %v517_v59, %v516_v58  ;;  %v3772_v21 = vpack.c.bf16 %v503_v16, %v502_v31  ;;  %v525_v53 = vld [vmem:[%s6523_s1 + $0x828] sm:$0xff]  ;;  %v574_v58 = vld [vmem:[%s6523_s1 + $0x9b0] sm:$0xff]  ;;  %v575_v59 = vld [vmem:[%s6523_s1 + $0x9b8] sm:$0xff] }
  0x75   : > { %3717 = vmatpush3.bf16.msra.mxu0 %v3716_v12  ;;  %v3738_v12 = vpack.c.bf16 %v487_v7, %v486_v6  ;;  %v558_v3 = vld [vmem:[%s6523_s1 + $0x930] sm:$0xff]  ;;  %v559_v5 = vld [vmem:[%s6523_s1 + $0x938] sm:$0xff]  ;;  %v544_v6 = vld [vmem:[%s6523_s1 + $0x8c0] sm:$0xff] }
  0x76   : > { %3719 = vmatprep.subr.bf16.mxu0 %v3718_v14  ;;  %v471_v14 = vld [vmem:[%s6523_s1 + $0x678] sm:$0xff]  ;;  %v545_v7 = vld [vmem:[%s6523_s1 + $0x8c8] sm:$0xff]  ;;  %v576_v8 = vld [vmem:[%s6523_s1 + $0x9c0] sm:$0xff] }
  0x77   : > { %3749 = vmatpush3.bf16.msra.mxu1 %v3748_v13  ;;  %v470_v13 = vld [vmem:[%s6523_s1 + $0x670] sm:$0xff]  ;;  %v577_v9 = vld [vmem:[%s6523_s1 + $0x9c8] sm:$0xff]  ;;  %v560_v31 = vld [vmem:[%s6523_s1 + $0x940] sm:$0xff] }
  0x78   : > { %3751 = vmatprep.subr.bf16.mxu1 %v3750_v17  ;;  %v536_v17 = vld [vmem:[%s6523_s1 + $0x880] sm:$0xff]  ;;  %v3740_v20 = vpack.c.bf16 %v471_v14, %v470_v13  ;;  %v529_v14 = vld [vmem:[%s6523_s1 + $0x848] sm:$0xff]  ;;  %v550_v45 = vld [vmem:[%s6523_s1 + $0x8f0] sm:$0xff] }
  0x79   : > { %3721 = vmatpush3.bf16.msra.mxu0 %v3720_v23  ;;  %v3774_v23 = vpack.c.bf16 %v537_v36, %v536_v17  ;;  %v528_v13 = vld [vmem:[%s6523_s1 + $0x840] sm:$0xff]  ;;  %v561_v16 = vld [vmem:[%s6523_s1 + $0x948] sm:$0xff]  ;;  %v546_v17 = vld [vmem:[%s6523_s1 + $0x8d0] sm:$0xff] }
  0x7a   : > { %3723 = vmatprep.subr.bf16.mxu0 %v3722_v26  ;;  %v521_v26 = vld [vmem:[%s6523_s1 + $0x808] sm:$0xff]  ;;  %v547_v36 = vld [vmem:[%s6523_s1 + $0x8d8] sm:$0xff]  ;;  %v564_v22 = vld [vmem:[%s6523_s1 + $0x960] sm:$0xff] }
  0x7b   : > { %3753 = vmatpush3.bf16.msra.mxu1 %v3752_v24  ;;  %v520_v24 = vld [vmem:[%s6523_s1 + $0x800] sm:$0xff]  ;;  %v551_v25 = vld [vmem:[%s6523_s1 + $0x8f8] sm:$0xff] }
  0x7c   : > { %3755 = vmatprep.subr.bf16.mxu1 %v3754_v30  ;;  %v538_v30 = vld [vmem:[%s6523_s1 + $0x890] sm:$0xff]  ;;  %v3776_v37 = vpack.c.bf16 %v521_v26, %v520_v24  ;;  %v531_v26 = vld [vmem:[%s6523_s1 + $0x858] sm:$0xff] }
  0x7d   : > { %3725 = vmatpush3.bf16.msra.mxu0 %v3724_v38  ;;  %v4840_v38 = vld [vmem:[%s4144_s15 + $0x48] sm:$0xff]  ;;  %v530_v24 = vld [vmem:[%s6523_s1 + $0x850] sm:$0xff] }
  0x7e   : > { %3727 = vmatprep.subr.bf16.mxu0 %v3726_v40  ;;  %v3778_v40 = vpack.c.bf16 %v539_v32, %v538_v30  ;;  %v548_v30 = vld [vmem:[%s6523_s1 + $0x8e0] sm:$0xff]  ;;  %v549_v32 = vld [vmem:[%s6523_s1 + $0x8e8] sm:$0xff] }
  0x7f   : > { %3757 = vmatpush3.bf16.msra.mxu1 %v3756_v39  ;;  %v3808_v39 = vpack.c.bf16 %v553_v29, %v552_v27  ;;  %v562_v27 = vld [vmem:[%s6523_s1 + $0x950] sm:$0xff]  ;;  %v563_v29 = vld [vmem:[%s6523_s1 + $0x958] sm:$0xff] }
  0x80   : > { %3759 = vmatprep.subr.bf16.mxu1 %v3758_v43  ;;  %v3810_v43 = vpack.c.bf16 %v571_v34, %v570_v33  ;;  %v580_v33 = vld [vmem:[%s6523_s1 + $0x9e0] sm:$0xff]  ;;  %v581_v34 = vld [vmem:[%s6523_s1 + $0x9e8] sm:$0xff] }
  0x81   : > { %3729 = vmatpush3.bf16.msra.mxu0 %v3728_v48  ;;  %v573_v48 = vld [vmem:[%s6523_s1 + $0x9a8] sm:$0xff] }
  0x82   : > { %3731 = vmatprep.subr.bf16.mxu0 %v3730_v50  ;;  %v3780_v50 = vpack.c.bf16 %v523_v42, %v522_v41  ;;  %v3814_v55 = vpack.c.bf16 %v573_v48, %v572_v47  ;;  %v532_v41 = vld [vmem:[%s6523_s1 + $0x860] sm:$0xff]  ;;  %v533_v42 = vld [vmem:[%s6523_s1 + $0x868] sm:$0xff]  ;;  %v583_v47 = vld [vmem:[%s6523_s1 + $0x9f8] sm:$0xff] }
  0x83   : > { %3761 = vmatpush3.bf16.msra.mxu1 %v3760_v49  ;;  %v676_v49 = vcombine.high %v4840_v38, %v4840_v38  ;;  %v3800_v48 = vpack.c.bf16 %v533_v42, %v532_v41  ;;  %v590_v41 = vld [vmem:[%s6523_s1 + $0xa30] sm:$0xff]  ;;  %v591_v42 = vld [vmem:[%s6523_s1 + $0xa38] sm:$0xff] }
  0x84   : > { %3763 = vmatprep.subr.bf16.mxu1 %v3762_v54  ;;  %v556_v54 = vld [vmem:[%s6523_s1 + $0x920] sm:$0xff] }
  0x85   : > { %3733 = vmatpush3.bf16.msra.mxu0 %v3732_v61 }
  0x86   : > { %3735 = vmatprep.subr.bf16.mxu0 %v3734_v0  ;;  %v3786_v0 = vpack.c.bf16 %v543_v57, %v542_v56  ;;  %v632_v56 = vld [vmem:[%s6523_s1 + $0xb80] sm:$0xff]  ;;  %v633_v57 = vld [vmem:[%s6523_s1 + $0xb88] sm:$0xff] }
  0x87   : > { %3765 = vmatpush3.bf16.msra.mxu1 %v3764_v63 }
  0x88   : > { %3767 = vmatprep.subr.bf16.mxu1 %v3766_v4  ;;  %v3818_v4 = vpack.c.bf16 %v575_v59, %v574_v58 }
  0x89   : > { %3737 = vmatpush3.bf16.msra.mxu0 %v3736_v10  ;;  %v3788_v10 = vpack.c.bf16 %v527_v2, %v526_v1  ;;  %v616_v1 = vld [vmem:[%s6523_s1 + $0xb00] sm:$0xff]  ;;  %v3870_v2 = vpack.c.bf16 %v633_v57, %v632_v56  ;;  %v642_v56 = vld [vmem:[%s6523_s1 + $0xbd0] sm:$0xff]  ;;  %v643_v57 = vld [vmem:[%s6523_s1 + $0xbd8] sm:$0xff] }
  0x8a   : > { %3739 = vmatprep.subr.bf16.mxu0 %v3738_v12  ;;  %v3790_v12 = vpack.c.bf16 %v545_v7, %v544_v6  ;;  %v634_v6 = vld [vmem:[%s6523_s1 + $0xb90] sm:$0xff]  ;;  %v635_v7 = vld [vmem:[%s6523_s1 + $0xb98] sm:$0xff] }
  0x8b   : > { %3769 = vmatpush3.bf16.msra.mxu1 %v3768_v11  ;;  %v3820_v11 = vpack.c.bf16 %v559_v5, %v558_v3  ;;  %v617_v3 = vld [vmem:[%s6523_s1 + $0xb08] sm:$0xff]  ;;  %v603_v5 = vld [vmem:[%s6523_s1 + $0xa98] sm:$0xff] }
  0x8c   : > { %3771 = vmatprep.subr.bf16.mxu1 %v3770_v15  ;;  %v3822_v15 = vpack.c.bf16 %v577_v9, %v576_v8  ;;  %v5041_v8 = vld [vmem:[%s4144_s15 + $0x50] sm:$0xff] }
  0x8d   : > { %3741 = vmatpush3.bf16.msra.mxu0 %v3740_v20  ;;  %v3792_v20 = vpack.c.bf16 %v529_v14, %v528_v13  ;;  %v586_v13 = vld [vmem:[%s6523_s1 + $0xa10] sm:$0xff]  ;;  %v587_v14 = vld [vmem:[%s6523_s1 + $0xa18] sm:$0xff] }
  0x8e   : > { %3775 = vmatprep.subr.bf16.mxu0 %v3774_v23  ;;  %v3794_v23 = vpack.c.bf16 %v547_v36, %v546_v17  ;;  %v604_v17 = vld [vmem:[%s6523_s1 + $0xaa0] sm:$0xff]  ;;  %v605_v36 = vld [vmem:[%s6523_s1 + $0xaa8] sm:$0xff] }
  0x8f   : > { %3773 = vmatpush3.bf16.msra.mxu1 %v3772_v21  ;;  %v3824_v21 = vpack.c.bf16 %v561_v16, %v560_v31  ;;  %v618_v31 = vld [vmem:[%s6523_s1 + $0xb10] sm:$0xff]  ;;  %v619_v16 = vld [vmem:[%s6523_s1 + $0xb18] sm:$0xff] }
  0x90   : > { %3807 = vmatprep.subr.bf16.mxu1 %v3806_v28  ;;  %1176 = vmatmul.mubr.f32.vlgmr.msra.gmra.mrb[6].mxu0 %v4633_v60  ;;  %v524_v60 = vld [vmem:[%s6523_s1 + $0x820] sm:$0xff]  ;;  %v3826_v28 = vpack.c.bf16 %v579_v19, %v578_v18  ;;  %v677_v18 = vcombine.high %v5041_v8, %v5041_v8 }
  0x91   : > { %3777 = vmatpush3.bf16.msra.mxu0 %v3776_v37  ;;  %1315 = vmatprep.mubr.f32.mxu0 %v675_v46  ;;  %v3784_v61 = vpack.c.bf16 %v525_v53, %v524_v60  ;;  %v3796_v37 = vpack.c.bf16 %v531_v26, %v530_v24  ;;  %v582_v46 = vld [vmem:[%s6523_s1 + $0x9f0] sm:$0xff]  ;;  %v636_v19 = vld [vmem:[%s6523_s1 + $0xba0] sm:$0xff]  ;;  %v3876_v24 = vpack.c.bf16 %v619_v16, %v618_v31  ;;  %v629_v16 = vld [vmem:[%s6523_s1 + $0xb68] sm:$0xff] }
  0x92   : > { %1246 = vmatmul.mubr.f32.vlgmr.msra.gmra.mrb[6].mxu1 %v4636_v62  ;;  %3779 = vmatprep.subr.bf16.mxu0 %v3778_v40  ;;  %v557_v62 = vld [vmem:[%s6523_s1 + $0x928] sm:$0xff]  ;;  %v3798_v40 = vpack.c.bf16 %v549_v32, %v548_v30  ;;  %v566_v60 = vld [vmem:[%s6523_s1 + $0x970] sm:$0xff]  ;;  %v3834_v53 = vpack.c.bf16 %v583_v47, %v582_v46  ;;  %v3846_v26 = vpack.c.bf16 %v605_v36, %v604_v17  ;;  %v607_v32 = vld [vmem:[%s6523_s1 + $0xab8] sm:$0xff] }
  0x93   : > { %3809 = vmatpush3.bf16.msra.mxu1 %v3808_v39  ;;  %1385 = vmatprep.mubr.f32.mxu1 %v676_v49  ;;  %v3816_v63 = vpack.c.bf16 %v557_v62, %v556_v54  ;;  %v3828_v39 = vpack.c.bf16 %v563_v29, %v562_v27  ;;  %v3832_v49 = vpack.c.bf16 %v565_v44, %v564_v22  ;;  %v567_v54 = vld [vmem:[%s6523_s1 + $0x978] sm:$0xff]  ;;  %v601_v62 = vld [vmem:[%s6523_s1 + $0xa88] sm:$0xff]  ;;  %v606_v30 = vld [vmem:[%s6523_s1 + $0xab0] sm:$0xff] }
  0x94   : > { %3811 = vmatprep.subr.bf16.mxu1 %v3810_v43  ;;  %v3830_v43 = vpack.c.bf16 %v581_v34, %v580_v33  ;;  %v3836_v59 = vpack.c.bf16 %v567_v54, %v566_v60  ;;  %v589_v27 = vld [vmem:[%s6523_s1 + $0xa28] sm:$0xff]  ;;  %v638_v33 = vld [vmem:[%s6523_s1 + $0xbb0] sm:$0xff]  ;;  %v639_v34 = vld [vmem:[%s6523_s1 + $0xbb8] sm:$0xff] }
  0x95   : > { %3781 = vmatpush3.bf16.msra.mxu0 %v3780_v50  ;;  %v3802_v50 = vpack.c.bf16 %v551_v25, %v550_v45  ;;  %v622_v22 = vld [vmem:[%s6523_s1 + $0xb30] sm:$0xff]  ;;  %v623_v44 = vld [vmem:[%s6523_s1 + $0xb38] sm:$0xff]  ;;  %v608_v45 = vld [vmem:[%s6523_s1 + $0xac0] sm:$0xff] }
  0x96   : > { %3783 = vmatprep.subr.bf16.mxu0 %v3782_v52  ;;  %v535_v52 = vld [vmem:[%s6523_s1 + $0x878] sm:$0xff]  ;;  %v609_v25 = vld [vmem:[%s6523_s1 + $0xac8] sm:$0xff]  ;;  %v640_v46 = vld [vmem:[%s6523_s1 + $0xbc0] sm:$0xff] }
  0x97   : > { %3813 = vmatpush3.bf16.msra.mxu1 %v3812_v51  ;;  %v534_v51 = vld [vmem:[%s6523_s1 + $0x870] sm:$0xff]  ;;  %v641_v47 = vld [vmem:[%s6523_s1 + $0xbc8] sm:$0xff]  ;;  %v624_v60 = vld [vmem:[%s6523_s1 + $0xb40] sm:$0xff] }
  0x98   : > { %3815 = vmatprep.subr.bf16.mxu1 %v3814_v55  ;;  %v600_v55 = vld [vmem:[%s6523_s1 + $0xa80] sm:$0xff]  ;;  %v3804_v58 = vpack.c.bf16 %v535_v52, %v534_v51  ;;  %v593_v52 = vld [vmem:[%s6523_s1 + $0xa48] sm:$0xff]  ;;  %v614_v17 = vld [vmem:[%s6523_s1 + $0xaf0] sm:$0xff] }
  0x99   : > { %3785 = vmatpush3.bf16.msra.mxu0 %v3784_v61  ;;  %v3838_v61 = vpack.c.bf16 %v601_v62, %v600_v55  ;;  %v592_v51 = vld [vmem:[%s6523_s1 + $0xa40] sm:$0xff]  ;;  %v625_v54 = vld [vmem:[%s6523_s1 + $0xb48] sm:$0xff]  ;;  %v610_v55 = vld [vmem:[%s6523_s1 + $0xad0] sm:$0xff] }
  0x9a   : > { %3787 = vmatprep.subr.bf16.mxu0 %v3786_v0  ;;  %v585_v0 = vld [vmem:[%s6523_s1 + $0xa08] sm:$0xff]  ;;  %v611_v62 = vld [vmem:[%s6523_s1 + $0xad8] sm:$0xff]  ;;  %v628_v31 = vld [vmem:[%s6523_s1 + $0xb60] sm:$0xff] }
  0x9b   : > { %3817 = vmatpush3.bf16.msra.mxu1 %v3816_v63  ;;  %v584_v63 = vld [vmem:[%s6523_s1 + $0xa00] sm:$0xff]  ;;  %v615_v36 = vld [vmem:[%s6523_s1 + $0xaf8] sm:$0xff] }
  0x9c   : > { %3819 = vmatprep.subr.bf16.mxu1 %v3818_v4  ;;  %v602_v4 = vld [vmem:[%s6523_s1 + $0xa90] sm:$0xff]  ;;  %v3840_v9 = vpack.c.bf16 %v585_v0, %v584_v63  ;;  %v595_v0 = vld [vmem:[%s6523_s1 + $0xa58] sm:$0xff] }
  0x9d   : > { %3789 = vmatpush3.bf16.msra.mxu0 %v3788_v10  ;;  %v5044_v10 = vld [vmem:[%s4144_s15 + $0x58] sm:$0xff]  ;;  %v594_v63 = vld [vmem:[%s6523_s1 + $0xa50] sm:$0xff] }
  0x9e   : > { %3791 = vmatprep.subr.bf16.mxu0 %v3790_v12  ;;  %v3842_v12 = vpack.c.bf16 %v603_v5, %v602_v4  ;;  %v612_v4 = vld [vmem:[%s6523_s1 + $0xae0] sm:$0xff]  ;;  %v613_v5 = vld [vmem:[%s6523_s1 + $0xae8] sm:$0xff] }
  0x9f   : > { %3821 = vmatpush3.bf16.msra.mxu1 %v3820_v11  ;;  %v3872_v11 = vpack.c.bf16 %v617_v3, %v616_v1  ;;  %v626_v1 = vld [vmem:[%s6523_s1 + $0xb50] sm:$0xff]  ;;  %v627_v3 = vld [vmem:[%s6523_s1 + $0xb58] sm:$0xff] }
  0xa0   : > { %3823 = vmatprep.subr.bf16.mxu1 %v3822_v15  ;;  %v3874_v15 = vpack.c.bf16 %v635_v7, %v634_v6  ;;  %v644_v6 = vld [vmem:[%s6523_s1 + $0xbe0] sm:$0xff]  ;;  %v645_v7 = vld [vmem:[%s6523_s1 + $0xbe8] sm:$0xff] }
  0xa1   : > { %3793 = vmatpush3.bf16.msra.mxu0 %v3792_v20  ;;  %v637_v20 = vld [vmem:[%s6523_s1 + $0xba8] sm:$0xff] }
  0xa2   : > { %3795 = vmatprep.subr.bf16.mxu0 %v3794_v23  ;;  %v3844_v23 = vpack.c.bf16 %v587_v14, %v586_v13  ;;  %v3878_v29 = vpack.c.bf16 %v637_v20, %v636_v19  ;;  %v596_v13 = vld [vmem:[%s6523_s1 + $0xa60] sm:$0xff]  ;;  %v597_v14 = vld [vmem:[%s6523_s1 + $0xa68] sm:$0xff]  ;;  %v647_v19 = vld [vmem:[%s6523_s1 + $0xbf8] sm:$0xff] }
  0xa3   : > { %3825 = vmatpush3.bf16.msra.mxu1 %v3824_v21  ;;  %v678_v21 = vcombine.high %v5044_v10, %v5044_v10  ;;  %v3864_v20 = vpack.c.bf16 %v597_v14, %v596_v13 }
  0xa4   : > { %3827 = vmatprep.subr.bf16.mxu1 %v3826_v28  ;;  %v620_v28 = vld [vmem:[%s6523_s1 + $0xb20] sm:$0xff] }
  0xa5   : > { %3797 = vmatpush3.bf16.msra.mxu0 %v3796_v37 }
  0xa6   : > { %3799 = vmatprep.subr.bf16.mxu0 %v3798_v40  ;;  %v3850_v40 = vpack.c.bf16 %v607_v32, %v606_v30  ;;  %v3094_v32 = vld [vmem:[%s6524_s2] ss:$0 sm:$0xff] }
  0xa7   : > { %3829 = vmatpush3.bf16.msra.mxu1 %v3828_v39 }
  0xa8   : > { %3831 = vmatprep.subr.bf16.mxu1 %v3830_v43  ;;  %v3882_v43 = vpack.c.bf16 %v639_v34, %v638_v33 }
  0xa9   : > { %3801 = vmatpush3.bf16.msra.mxu0 %v3800_v48  ;;  %v3852_v48 = vpack.c.bf16 %v591_v42, %v590_v41 }
  0xaa   : > { %3803 = vmatprep.subr.bf16.mxu0 %v3802_v50  ;;  %v3854_v50 = vpack.c.bf16 %v609_v25, %v608_v45 }
  0xab   : > { %3833 = vmatpush3.bf16.msra.mxu1 %v3832_v49  ;;  %v3884_v49 = vpack.c.bf16 %v623_v44, %v622_v22 }
  0xac   : > { %3835 = vmatprep.subr.bf16.mxu1 %v3834_v53  ;;  %v3886_v53 = vpack.c.bf16 %v641_v47, %v640_v46 }
  0xad   : > { %3805 = vmatpush3.bf16.msra.mxu0 %v3804_v58  ;;  %v3856_v58 = vpack.c.bf16 %v593_v52, %v592_v51 }
  0xae   : > { %3839 = vmatprep.subr.bf16.mxu0 %v3838_v61  ;;  %v3858_v61 = vpack.c.bf16 %v611_v62, %v610_v55 }
  0xaf   : > { %3837 = vmatpush3.bf16.msra.mxu1 %v3836_v59  ;;  %v3888_v59 = vpack.c.bf16 %v625_v54, %v624_v60 }
  0xb0   : > { %3871 = vmatprep.subr.bf16.mxu1 %v3870_v2  ;;  %1316 = vmatmul.mubr.f32.vlgmr.msra.gmra.mrb[8].mxu0 %v4837_v35  ;;  %v588_v35 = vld [vmem:[%s6523_s1 + $0xa20] sm:$0xff]  ;;  %v3890_v2 = vpack.c.bf16 %v643_v57, %v642_v56 }
  0xb1   : > { %3841 = vmatpush3.bf16.msra.mxu0 %v3840_v9  ;;  %1455 = vmatprep.mubr.f32.mxu0 %v677_v18  ;;  %v3848_v37 = vpack.c.bf16 %v589_v27, %v588_v35  ;;  %v3860_v9 = vpack.c.bf16 %v595_v0, %v594_v63  ;;  %v646_v18 = vld [vmem:[%s6523_s1 + $0xbf0] sm:$0xff] }
  0xb2   : > { %1386 = vmatmul.mubr.f32.vlgmr.msra.gmra.mrb[8].mxu1 %v4840_v38  ;;  %3843 = vmatprep.subr.bf16.mxu0 %v3842_v12  ;;  %v621_v38 = vld [vmem:[%s6523_s1 + $0xb28] sm:$0xff]  ;;  %v3862_v12 = vpack.c.bf16 %v613_v5, %v612_v4  ;;  %v3898_v35 = vpack.c.bf16 %v647_v19, %v646_v18  ;;  %v630_v27 = vld [vmem:[%s6523_s1 + $0xb70] sm:$0xff] }
  0xb3   : > { %3873 = vmatpush3.bf16.msra.mxu1 %v3872_v11  ;;  %1525 = vmatprep.mubr.f32.mxu1 %v678_v21  ;;  %v3880_v39 = vpack.c.bf16 %v621_v38, %v620_v28  ;;  %v3892_v11 = vpack.c.bf16 %v627_v3, %v626_v1  ;;  %v3896_v21 = vpack.c.bf16 %v629_v16, %v628_v31  ;;  %v631_v28 = vld [vmem:[%s6523_s1 + $0xb78] sm:$0xff] }
  0xb4   : > { %3875 = vmatprep.subr.bf16.mxu1 %v3874_v15  ;;  %v3894_v15 = vpack.c.bf16 %v645_v7, %v644_v6  ;;  %v3900_v38 = vpack.c.bf16 %v631_v28, %v630_v27  ;;  %v1550_v7 = vlaneseq }
  0xb5   : > { %3845 = vmatpush3.bf16.msra.mxu0 %v3844_v23  ;;  %v3866_v23 = vpack.c.bf16 %v615_v36, %v614_v17 }
  0xb6   : > { %3847 = vmatprep.subr.bf16.mxu0 %v3846_v26  ;;  %v599_v26 = vld [vmem:[%s6523_s1 + $0xa78] sm:$0xff]  ;;  %v5213_v13 = vshrl.u32 %v1550_v7, 7 }
  0xb7   : > { %3877 = vmatpush3.bf16.msra.mxu1 %v3876_v24  ;;  %v598_v24 = vld [vmem:[%s6523_s1 + $0xa70] sm:$0xff] }
  0xb8   : > { %3879 = vmatprep.subr.bf16.mxu1 %v3878_v29  ;;  %v3868_v29 = vpack.c.bf16 %v599_v26, %v598_v24  ;;  %v5216_v17 = vsub.s32 2, %v5213_v13  ;;  %v5219_v18 = vsub.s32 0, %v5213_v13  ;;  %v5222_v19 = vsub.s32 3, %v5213_v13 }
  0xb9   : > { %3849 = vmatpush3.bf16.msra.mxu0 %v3848_v37 }
  0xba   : > { %3851 = vmatprep.subr.bf16.mxu0 %v3850_v40 }
  0xbb   : > { %3881 = vmatpush3.bf16.msra.mxu1 %v3880_v39 }
  0xbc   : > { %3883 = vmatprep.subr.bf16.mxu1 %v3882_v43 }
  0xbd   : > { %3853 = vmatpush3.bf16.msra.mxu0 %v3852_v48 }
  0xbe   : > { %3855 = vmatprep.subr.bf16.mxu0 %v3854_v50 }
  0xbf   : > { %3885 = vmatpush3.bf16.msra.mxu1 %v3884_v49 }
  0xc0   : > { %3887 = vmatprep.subr.bf16.mxu1 %v3886_v53 }
  0xc1   : > { %3857 = vmatpush3.bf16.msra.mxu0 %v3856_v58 }
  0xc2   : > { %3859 = vmatprep.subr.bf16.mxu0 %v3858_v61 }
  0xc3   : > { %3889 = vmatpush3.bf16.msra.mxu1 %v3888_v59 }
  0xc4   : > { %3891 = vmatprep.subr.bf16.mxu1 %v3890_v2 }
  0xc5   : > { %3861 = vmatpush3.bf16.msra.mxu0 %v3860_v9 }
  0xc6   : > { %3863 = vmatprep.subr.bf16.mxu0 %v3862_v12 }
  0xc7   : > { %3893 = vmatpush3.bf16.msra.mxu1 %v3892_v11 }
  0xc8   : > { %3895 = vmatprep.subr.bf16.mxu1 %v3894_v15 }
  0xc9   : > { %3865 = vmatpush3.bf16.msra.mxu0 %v3864_v20  ;;  %v5225_v20 = vsub.s32 1, %v5213_v13 }
  0xca   : > { %3867 = vmatprep.subr.bf16.mxu0 %v3866_v23  ;;  %v1532_v23 = vld [vmem:[%s6525_s3] sm:$0xff] }
  0xcb   : > { %3897 = vmatpush3.bf16.msra.mxu1 %v3896_v21 }
  0xcc   : > { %3899 = vmatprep.subr.bf16.mxu1 %v3898_v35 }
  0xcd   : > { %3869 = vmatpush3.bf16.msra.mxu0 %v3868_v29 }
  0xcf   : > { %3901 = vmatpush3.bf16.msra.mxu1 %v3900_v38 }
  0xd0   : > { %1456 = vmatmul.mubr.f32.vlgmr.msra.gmra.mrb[10].mxu0 %v5041_v8 }
  0xd2   : > { %1526 = vmatmul.mubr.f32.vlgmr.msra.gmra.mrb[10].mxu1 %v5044_v10 }
 0x103   : > { %v3130_v30 = vpop.f32.mrb[0].mxu0 }
 0x104   : > { %v3131_v33 = vpop.f32.mrb[1].mxu0 }
 0x105   : > { %v3165_v34 = vpop.f32.mrb[0].mxu1  ;;  %v3132_v37 = vadd.f32 %v3131_v33, %v3130_v30 }
 0x106   : > { %v3166_v39 = vpop.f32.mrb[1].mxu1 }
 0x107   : > { %v3167_v40 = vadd.f32 %v3166_v39, %v3165_v34  ;;  %v758_v41 = vadd.f32 %v3132_v37, %v3094_v32  ;;  %v3934_v39 = vmov 0  }
 0x108   : > { %3912 = vset.pattern.permute.xlu0 %v3934_v39  ;;  %3913 = vset.pattern.permute.xlu1 %v3934_v39 }
 0x109   : > { %v828_v42 = vadd.f32 %v3167_v40, %v758_v41  ;;  %v1533_v40 = vld [vmem:[%s6526_s4] sm:$0xff] }
 0x123   : > { %v3200_v22 = vpop.f32.mrb[2].mxu0 }
 0x124   : > { %v3201_v43 = vpop.f32.mrb[3].mxu0 }
 0x125   : > { %v3235_v44 = vpop.f32.mrb[2].mxu1  ;;  %v3202_v45 = vadd.f32 %v3201_v43, %v3200_v22 }
 0x126   : > { %v3236_v25 = vpop.f32.mrb[3].mxu1 }
 0x127   : > { %v3237_v8 = vadd.f32 %v3236_v25, %v3235_v44  ;;  %v898_v46 = vadd.f32 %v3202_v45, %v828_v42 }
 0x129   : > { %v968_v10 = vadd.f32 %v3237_v8, %v898_v46  ;;  %v5240_v46 = vld [vmem:[%s6527_s5] sm:$0xff] }
 0x143   : > { %v3270_v47 = vpop.f32.mrb[4].mxu0 }
 0x144   : > { %v3271_v48 = vpop.f32.mrb[5].mxu0 }
 0x145   : > { %v3305_v49 = vpop.f32.mrb[4].mxu1  ;;  %v3272_v50 = vadd.f32 %v3271_v48, %v3270_v47  ;;  %v5250_v47 = vld [vmem:[%s6527_s5 + $0x10] sm:$0xff]  ;;  %v5253_v48 = vsub.s32 4, %v5213_v13 }
 0x146   : > { %v3306_v51 = vpop.f32.mrb[5].mxu1 }
 0x147   : > { %v3307_v52 = vadd.f32 %v3306_v51, %v3305_v49  ;;  %v1038_v60 = vadd.f32 %v3272_v50, %v968_v10  ;;  %v5245_v10 = vld [vmem:[%s6527_s5 + $0x8] sm:$0xff]  ;;  %v5258_v49 = vld [vmem:[%s6527_s5 + $0x18] sm:$0xff]  ;;  %v5263_v50 = vld [vmem:[%s6527_s5 + $0x20] sm:$0xff] }
 0x148   : > { %v5268_v51 = vld [vmem:[%s6527_s5 + $0x28] sm:$0xff] }
 0x149   : > { %v1108_v53 = vadd.f32 %v3307_v52, %v1038_v60  ;;  %v5273_v52 = vld [vmem:[%s6527_s5 + $0x30] sm:$0xff]  ;;  %v5278_v60 = vld [vmem:[%s6527_s5 + $0x38] sm:$0xff]  ;;  %v1628_v7 = vrot.slane %v5268_v51, %v5253_v48 }
 0x163   : > { %v3340_v54 = vpop.f32.mrb[6].mxu0 }
 0x164   : > { %v3341_v55 = vpop.f32.mrb[7].mxu0 }
 0x165   : > { %v3375_v62 = vpop.f32.mrb[6].mxu1  ;;  %v3342_v56 = vadd.f32 %v3341_v55, %v3340_v54  ;;  %v1592_v54 = vrot.slane %v5245_v10, %v5219_v18  ;;  %v1600_v55 = vrot.slane %v5250_v47, %v5219_v18 }
 0x166   : > { %v3376_v57 = vpop.f32.mrb[7].mxu1 }
 0x167   : > { %v3377_v58 = vadd.f32 %v3376_v57, %v3375_v62  ;;  %v1178_v59 = vadd.f32 %v3342_v56, %v1108_v53  ;;  %v1584_v53 = vrot.slane %v5240_v46, %v5219_v18  ;;  %v5289_v62 = vld [vmem:[%s6527_s5 + $0x40] sm:$0xff]  ;;  %v5294_v56 = vld [vmem:[%s6527_s5 + $0x48] sm:$0xff]  ;;  %v1588_v57 = vrot.slane %v5240_v46, %v5253_v48 }
 0x169   : > { %v1248_v61 = vadd.f32 %v3377_v58, %v1178_v59  ;;  %v1596_v58 = vrot.slane %v5245_v10, %v5253_v48  ;;  %v1604_v59 = vrot.slane %v5250_v47, %v5253_v48  ;;  %v5385_v39 = vrot.slane %v1584_v53, %v5219_v18 }
 0x16a   : > { %v5418_v53 = vrot.slane %v1628_v7, %v5219_v18 }
 0x16c   : > { %6536 = vst [vmem:[#allocation8_spill] sm:$0xff] %v5418_v53 }
 0x183   : > { %v3410_v63 = vpop.f32.mrb[8].mxu0 }
 0x184   : > { %v3411_v0 = vpop.f32.mrb[9].mxu0 }
 0x185   : > { %v3445_v1 = vpop.f32.mrb[8].mxu1  ;;  %v3412_v2 = vadd.f32 %v3411_v0, %v3410_v63  ;;  %v5307_v63 = vld [vmem:[%s6527_s5 + $0x50] sm:$0xff]  ;;  %v5312_v0 = vld [vmem:[%s6527_s5 + $0x58] sm:$0xff] }
 0x186   : > { %v3446_v3 = vpop.f32.mrb[9].mxu1 }
 0x187   : > { %v3447_v4 = vadd.f32 %v3446_v3, %v3445_v1  ;;  %v1318_v5 = vadd.f32 %v3412_v2, %v1248_v61  ;;  %v1608_v61 = vrot.slane %v5258_v49, %v5219_v18  ;;  %v1612_v1 = vrot.slane %v5258_v49, %v5253_v48 }
 0x188   : > { %v1616_v2 = vrot.slane %v5263_v50, %v5219_v18  ;;  %v1620_v3 = vrot.slane %v5263_v50, %v5253_v48 }
 0x189   : > { %v1388_v6 = vadd.f32 %v3447_v4, %v1318_v5  ;;  %v1624_v4 = vrot.slane %v5268_v51, %v5219_v18  ;;  %v5325_v5 = vld [vmem:[%s6527_s5 + $0x60] sm:$0xff] }
 0x1a3   : > { %v3480_v9 = vpop.f32.mrb[10].mxu0 }
 0x1a4   : > { %v3481_v11 = vpop.f32.mrb[11].mxu0 }
 0x1a5   : > { %v3515_v12 = vpop.f32.mrb[10].mxu1  ;;  %v3482_v14 = vadd.f32 %v3481_v11, %v3480_v9  ;;  %v1632_v9 = vrot.slane %v5273_v52, %v5219_v18  ;;  %v1636_v11 = vrot.slane %v5273_v52, %v5253_v48 }
 0x1a6   : > { %v3516_v31 = vpop.f32.mrb[11].mxu1 }
 0x1a7   : > { %v3517_v15 = vadd.f32 %v3516_v31, %v3515_v12  ;;  %v1458_v16 = vadd.f32 %v3482_v14, %v1388_v6  ;;  %v5330_v6 = vld [vmem:[%s6527_s5 + $0x68] sm:$0xff]  ;;  %v1640_v12 = vrot.slane %v5278_v60, %v5219_v18  ;;  %v5343_v14 = vld [vmem:[%s6527_s5 + $0x70] sm:$0xff]  ;;  %v5348_v31 = vld [vmem:[%s6527_s5 + $0x78] sm:$0xff] }
 0x1a9   : > { %v1528_v36 = vadd.f32 %v3517_v15, %v1458_v16  ;;  %v1644_v15 = vrot.slane %v5278_v60, %v5253_v48  ;;  %v1648_v16 = vrot.slane %v5289_v62, %v5219_v18 }
 0x1ab   : > { %v1531_v21 = vmax.f32 %v1528_v36, 0.0  ;;  %v1652_v36 = vrot.slane %v5289_v62, %v5253_v48 }
 0x1ad   : > { %v2270_v24 = vrot.slane %v1531_v21, %v5216_v17  ;;  %v1553_v26 = vrot.slane %v1531_v21, %v5219_v18  ;;  %v2636_v35 = vrot.slane %v1531_v21, %v5222_v19  ;;  %v1904_v27 = vrot.slane %v1531_v21, %v5225_v20 }
 0x1ae   : > { %v1656_v21 = vrot.slane %v5294_v56, %v5219_v18 }
 0x1af   : > { %v2271_v28 = vmul.f32 %v2270_v24, %v1532_v23  ;;  %v1554_v29 = vmul.f32 %v1553_v26, %v1532_v23  ;;  %v2637_v32 = vmul.f32 %v2636_v35, %v1532_v23  ;;  %v1905_v33 = vmul.f32 %v1904_v27, %v1532_v23 }
 0x1b0   : > { %v1660_v23 = vrot.slane %v5294_v56, %v5253_v48  ;;  %v1664_v24 = vrot.slane %v5307_v63, %v5219_v18  ;;  %v1668_v26 = vrot.slane %v5307_v63, %v5253_v48  ;;  %v1672_v35 = vrot.slane %v5312_v0, %v5219_v18 }
 0x1b1   : > { %v2272_v38 = vsel %vm1555_vm0, %v2271_v28, 0.0  ;;  %v1556_v30 = vsel %vm1555_vm0, %v1554_v29, 0.0  ;;  %v2638_v34 = vsel %vm1555_vm0, %v2637_v32, 0.0  ;;  %v1906_v37 = vsel %vm1555_vm0, %v1905_v33, 0.0 }
 0x1b2   : > { %2273 = vadd.xlane.f32.xlu1 %v2272_v38  ;;  %1557 = vadd.xlane.f32.xlu0 %v1556_v30  ;;  %v1676_v27 = vrot.slane %v5312_v0, %v5253_v48  ;;  %v1680_v28 = vrot.slane %v5325_v5, %v5219_v18  ;;  %v1684_v29 = vrot.slane %v5325_v5, %v5253_v48 }
 0x1b3   : > { %v1688_v38 = vrot.slane %v5330_v6, %v5219_v18  ;;  %v1692_v30 = vrot.slane %v5330_v6, %v5253_v48  ;;  %v1696_v32 = vrot.slane %v5343_v14, %v5219_v18  ;;  %v1700_v33 = vrot.slane %v5343_v14, %v5253_v48 }
 0x1b4   : > { %v5451_v7 = vrot.slane %v1668_v26, %v5219_v18 }
 0x1b6   : > { %2639 = vadd.xlane.f32.xlu1 %v2638_v34  ;;  %1907 = vadd.xlane.f32.xlu0 %v1906_v37  ;;  %v1704_v34 = vrot.slane %v5348_v31, %v5219_v18  ;;  %v1708_v37 = vrot.slane %v5348_v31, %v5253_v48  ;;  %v5415_v48 = vrot.slane %v1624_v4, %v5219_v18 }
 0x1b7   : > { %v5448_v4 = vrot.slane %v1664_v24, %v5219_v18  ;;  %6546 = vst [vmem:[#allocation18_spill] sm:$0xff] %v5451_v7 }
 0x1b8   : > { %6535 = vst [vmem:[#allocation7_spill] sm:$0xff] %v5415_v48  ;;  %v5478_v24 = vrot.slane %v1704_v34, %v5219_v18  ;;  %v5481_v26 = vrot.slane %v1708_v37, %v5219_v18  ;;  %v1958_v37 = vrot.slane %v5268_v51, %v5225_v20 }
 0x1b9   : > { %6545 = vst [vmem:[#allocation17_spill] sm:$0xff] %v5448_v4  ;;  %v2006_v4 = vrot.slane %v5312_v0, %v5225_v20 }
 0x1ba   : > { %6555 = vst [vmem:[#allocation27_spill] sm:$0xff] %v5478_v24  ;;  %6556 = vst [vmem:[#allocation28_spill] sm:$0xff] %v5481_v26  ;;  %v1966_v24 = vrot.slane %v5273_v52, %v5225_v20 }
 0x23f   : > { %v1558_v41 = vpop.xlane.xlu0 %1557  ;;  %v2274_v22 = vpop.xlane.xlu1 %2273 }
 0x240   : > { %v1559_v42 = vadd.f32 %v1558_v41, %v1533_v40  ;;  %v2275_v45 = vadd.f32 %v2274_v22, %v1533_v40  ;;  %v5391_v41 = vrot.slane %v1592_v54, %v5219_v18  ;;  %v5397_v22 = vrot.slane %v1600_v55, %v5219_v18 }
 0x241   : > { %v5421_v54 = vrot.slane %v1632_v9, %v5219_v18  ;;  %v5424_v55 = vrot.slane %v1636_v11, %v5219_v18  ;;  %v5454_v9 = vrot.slane %v1672_v35, %v5219_v18  ;;  %v5457_v11 = vrot.slane %v1676_v27, %v5219_v18 }
 0x242   : > { %1562 = vperm.xlu0 %3912, %v1559_v42   ;;  %v5394_v42 = vrot.slane %v1596_v58, %v5219_v18  ;;  %v5430_v58 = vrot.slane %v1644_v15, %v5219_v18  ;;  %v5463_v15 = vrot.slane %v1684_v29, %v5219_v18  ;;  %v1918_v35 = vrot.slane %v5240_v46, %v5225_v20 }
 0x243   : > { %v1908_v43 = vpop.xlane.xlu0 %1907  ;;  %v2640_v25 = vpop.xlane.xlu1 %2639  ;;  %6537 = vst [vmem:[#allocation9_spill] sm:$0xff] %v5421_v54  ;;  %6538 = vst [vmem:[#allocation10_spill] sm:$0xff] %v5424_v55  ;;  %v2038_v54 = vrot.slane %v5348_v31, %v5225_v20 }
 0x244   : > { %v1909_v44 = vadd.f32 %v1908_v43, %v1533_v40  ;;  %v2641_v8 = vadd.f32 %v2640_v25, %v1533_v40  ;;  %v5388_v40 = vrot.slane %v1588_v57, %v5219_v18  ;;  %v5400_v43 = vrot.slane %v1604_v59, %v5219_v18  ;;  %6540 = vst [vmem:[#allocation12_spill] sm:$0xff] %v5430_v58 }
 0x245   : > { %v5409_v25 = vrot.slane %v1616_v2, %v5219_v18  ;;  %v5427_v57 = vrot.slane %v1640_v12, %v5219_v18  ;;  %v5433_v59 = vrot.slane %v1648_v16, %v5219_v18  ;;  %v5442_v2 = vrot.slane %v1656_v21, %v5219_v18  ;;  %6547 = vst [vmem:[#allocation19_spill] sm:$0xff] %v5454_v9 }
 0x246   : > { %1912 = vperm.xlu1 %3913, %v1909_v44   ;;  %6530 = vst [vmem:[#allocation2_spill] sm:$0xff] %v5400_v43  ;;  %v5403_v44 = vrot.slane %v1608_v61, %v5219_v18  ;;  %v5436_v61 = vrot.slane %v1652_v36, %v5219_v18  ;;  %6548 = vst [vmem:[#allocation20_spill] sm:$0xff] %v5457_v11  ;;  %v5460_v12 = vrot.slane %v1680_v28, %v5219_v18 }
 0x247   : > { %6533 = vst [vmem:[#allocation5_spill] sm:$0xff] %v5409_v25  ;;  %6539 = vst [vmem:[#allocation11_spill] sm:$0xff] %v5427_v57  ;;  %v5466_v16 = vrot.slane %v1688_v38, %v5219_v18  ;;  %v5469_v36 = vrot.slane %v1692_v30, %v5219_v18  ;;  %v5472_v21 = vrot.slane %v1696_v32, %v5219_v18 }
 0x248   : > { %6531 = vst [vmem:[#allocation3_spill] sm:$0xff] %v5403_v44  ;;  %6541 = vst [vmem:[#allocation13_spill] sm:$0xff] %v5433_v59  ;;  %v1926_v28 = vrot.slane %v5245_v10, %v5225_v20  ;;  %v1934_v38 = vrot.slane %v5250_v47, %v5225_v20  ;;  %v1998_v9 = vrot.slane %v5307_v63, %v5225_v20 }
 0x249   : > { %6542 = vst [vmem:[#allocation14_spill] sm:$0xff] %v5436_v61  ;;  %6543 = vst [vmem:[#allocation15_spill] sm:$0xff] %v5442_v2  ;;  %v2014_v2 = vrot.slane %v5325_v5, %v5225_v20  ;;  %v2022_v59 = vrot.slane %v5330_v6, %v5225_v20  ;;  %v2030_v57 = vrot.slane %v5343_v14, %v5225_v20 }
 0x24a   : > { %2278 = vperm.xlu1 %3913, %v2275_v45   ;;  %v5406_v45 = vrot.slane %v1612_v1, %v5219_v18  ;;  %v5439_v1 = vsub.s32 5, %v5213_v13  ;;  %6549 = vst [vmem:[#allocation21_spill] sm:$0xff] %v5460_v12  ;;  %6550 = vst [vmem:[#allocation22_spill] sm:$0xff] %v5463_v15  ;;  %v1990_v12 = vrot.slane %v5294_v56, %v5225_v20 }
 0x24b   : > { %6551 = vst [vmem:[#allocation23_spill] sm:$0xff] %v5466_v16  ;;  %6552 = vst [vmem:[#allocation24_spill] sm:$0xff] %v5469_v36  ;;  %v1982_v16 = vrot.slane %v5289_v62, %v5225_v20  ;;  %v5548_v48 = vrot.slane %v1918_v35, %v5225_v20  ;;  %v5554_v25 = vrot.slane %v1926_v28, %v5225_v20 }
 0x24c   : > { %6532 = vst [vmem:[#allocation4_spill] sm:$0xff] %v5406_v45  ;;  %6553 = vst [vmem:[#allocation25_spill] sm:$0xff] %v5472_v21  ;;  %v1922_v27 = vrot.slane %v5240_v46, %v5439_v1  ;;  %v1930_v29 = vrot.slane %v5245_v10, %v5439_v1  ;;  %v1938_v30 = vrot.slane %v5250_v47, %v5439_v1 }
 0x24d   : > { %v1946_v32 = vrot.slane %v5258_v49, %v5439_v1  ;;  %v1954_v34 = vrot.slane %v5263_v50, %v5439_v1  ;;  %v1962_v26 = vrot.slane %v5268_v51, %v5439_v1  ;;  %v1974_v21 = vrot.slane %v5278_v60, %v5225_v20  ;;  %6558 = vst [vmem:[#allocation30_spill] sm:$0xff] %v5554_v25 }
 0x24e   : > { %2644 = vperm.xlu1 %3913, %v2641_v8   ;;  %v5412_v8 = vrot.slane %v1620_v3, %v5219_v18  ;;  %v5445_v3 = vrot.slane %v1660_v23, %v5219_v18  ;;  %v5475_v23 = vrot.slane %v1700_v33, %v5219_v18  ;;  %v1942_v18 = vrot.slane %v5258_v49, %v5225_v20 }
 0x24f   : > { %v1950_v33 = vrot.slane %v5263_v50, %v5225_v20  ;;  %v1978_v36 = vrot.slane %v5278_v60, %v5439_v1  ;;  %v1986_v15 = vrot.slane %v5289_v62, %v5439_v1  ;;  %v1994_v11 = vrot.slane %v5294_v56, %v5439_v1 }
 0x250   : > { %6534 = vst [vmem:[#allocation6_spill] sm:$0xff] %v5412_v8  ;;  %6544 = vst [vmem:[#allocation16_spill] sm:$0xff] %v5445_v3  ;;  %v2002_v7 = vrot.slane %v5307_v63, %v5439_v1  ;;  %v2010_v3 = vrot.slane %v5312_v0, %v5439_v1  ;;  %v2018_v61 = vrot.slane %v5325_v5, %v5439_v1 }
 0x251   : > { %6554 = vst [vmem:[#allocation26_spill] sm:$0xff] %v5475_v23  ;;  %v1970_v23 = vrot.slane %v5273_v52, %v5439_v1  ;;  %v2026_v58 = vrot.slane %v5330_v6, %v5439_v1  ;;  %v2034_v55 = vrot.slane %v5343_v14, %v5439_v1  ;;  %v2042_v53 = vrot.slane %v5348_v31, %v5439_v1 }
 0x252   : > { %v5551_v8 = vrot.slane %v1922_v27, %v5225_v20  ;;  %v5557_v45 = vrot.slane %v1930_v29, %v5225_v20  ;;  %v5560_v44 = vrot.slane %v1934_v38, %v5225_v20  ;;  %v5563_v43 = vrot.slane %v1938_v30, %v5225_v20 }
 0x253   : > { %v5566_v1 = vrot.slane %v1942_v18, %v5225_v20  ;;  %v5569_v35 = vrot.slane %v1946_v32, %v5225_v20  ;;  %v5572_v27 = vrot.slane %v1950_v33, %v5225_v20  ;;  %v5575_v28 = vrot.slane %v1954_v34, %v5225_v20 }
 0x254   : > { %6557 = vst [vmem:[#allocation29_spill] sm:$0xff] %v5551_v8  ;;  %6559 = vst [vmem:[#allocation31_spill] sm:$0xff] %v5557_v45  ;;  %v5578_v29 = vrot.slane %v1958_v37, %v5225_v20  ;;  %v5581_v38 = vrot.slane %v1962_v26, %v5225_v20  ;;  %v5584_v30 = vrot.slane %v1966_v24, %v5225_v20 }
 0x255   : > { %6560 = vst [vmem:[#allocation32_spill] sm:$0xff] %v5560_v44  ;;  %6561 = vst [vmem:[#allocation33_spill] sm:$0xff] %v5563_v43  ;;  %v5587_v18 = vrot.slane %v1970_v23, %v5225_v20  ;;  %v5590_v32 = vrot.slane %v1974_v21, %v5225_v20  ;;  %v5593_v33 = vrot.slane %v1978_v36, %v5225_v20 }
 0x256   : > { %6562 = vst [vmem:[#allocation34_spill] sm:$0xff] %v5566_v1  ;;  %6563 = vst [vmem:[#allocation35_spill] sm:$0xff] %v5569_v35  ;;  %v5596_v34 = vrot.slane %v1982_v16, %v5225_v20  ;;  %v5599_v37 = vrot.slane %v1986_v15, %v5225_v20  ;;  %v5602_v26 = vrot.slane %v1990_v12, %v5225_v20  ;;  %v5623_v12 = vsub.s32 6, %v5213_v13 }
 0x257   : > { %6564 = vst [vmem:[#allocation36_spill] sm:$0xff] %v5572_v27  ;;  %6565 = vst [vmem:[#allocation37_spill] sm:$0xff] %v5575_v28  ;;  %v5605_v24 = vrot.slane %v1994_v11, %v5225_v20  ;;  %v5608_v23 = vrot.slane %v1998_v9, %v5225_v20  ;;  %v5611_v21 = vrot.slane %v2002_v7, %v5225_v20 }
 0x258   : > { %6566 = vst [vmem:[#allocation38_spill] sm:$0xff] %v5578_v29  ;;  %6567 = vst [vmem:[#allocation39_spill] sm:$0xff] %v5581_v38  ;;  %v5614_v36 = vrot.slane %v2006_v4, %v5225_v20  ;;  %v5617_v16 = vrot.slane %v2010_v3, %v5225_v20  ;;  %v5620_v15 = vrot.slane %v2014_v2, %v5225_v20 }
 0x259   : > { %6568 = vst [vmem:[#allocation40_spill] sm:$0xff] %v5584_v30  ;;  %6569 = vst [vmem:[#allocation41_spill] sm:$0xff] %v5587_v18  ;;  %v5626_v11 = vrot.slane %v2018_v61, %v5225_v20  ;;  %v5629_v9 = vrot.slane %v2022_v59, %v5225_v20  ;;  %v5632_v7 = vrot.slane %v2026_v58, %v5225_v20 }
 0x25a   : > { %6570 = vst [vmem:[#allocation42_spill] sm:$0xff] %v5590_v32  ;;  %6571 = vst [vmem:[#allocation43_spill] sm:$0xff] %v5593_v33  ;;  %v5635_v4 = vrot.slane %v2030_v57, %v5225_v20  ;;  %v5638_v3 = vrot.slane %v2034_v55, %v5225_v20  ;;  %v5641_v2 = vrot.slane %v2038_v54, %v5225_v20 }
 0x25b   : > { %6572 = vst [vmem:[#allocation44_spill] sm:$0xff] %v5596_v34  ;;  %6573 = vst [vmem:[#allocation45_spill] sm:$0xff] %v5599_v37  ;;  %v2284_v61 = vrot.slane %v5240_v46, %v5216_v17  ;;  %v2292_v59 = vrot.slane %v5245_v10, %v5216_v17  ;;  %v2300_v58 = vrot.slane %v5250_v47, %v5216_v17 }
 0x25c   : > { %6574 = vst [vmem:[#allocation46_spill] sm:$0xff] %v5602_v26  ;;  %6575 = vst [vmem:[#allocation47_spill] sm:$0xff] %v5605_v24  ;;  %v2308_v57 = vrot.slane %v5258_v49, %v5216_v17  ;;  %v2316_v55 = vrot.slane %v5263_v50, %v5216_v17  ;;  %v2288_v54 = vrot.slane %v5240_v46, %v5623_v12 }
 0x25d   : > { %6576 = vst [vmem:[#allocation48_spill] sm:$0xff] %v5608_v23  ;;  %6577 = vst [vmem:[#allocation49_spill] sm:$0xff] %v5611_v21  ;;  %v2352_v21 = vrot.slane %v5289_v62, %v5623_v12  ;;  %v2356_v23 = vrot.slane %v5294_v56, %v5216_v17  ;;  %v2360_v24 = vrot.slane %v5294_v56, %v5623_v12 }
 0x25e   : > { %6578 = vst [vmem:[#allocation50_spill] sm:$0xff] %v5614_v36  ;;  %6579 = vst [vmem:[#allocation51_spill] sm:$0xff] %v5617_v16  ;;  %v2344_v16 = vrot.slane %v5278_v60, %v5623_v12  ;;  %v2348_v36 = vrot.slane %v5289_v62, %v5216_v17  ;;  %v2364_v26 = vrot.slane %v5307_v63, %v5216_v17 }
 0x25f   : > { %6580 = vst [vmem:[#allocation52_spill] sm:$0xff] %v5620_v15  ;;  %6581 = vst [vmem:[#allocation53_spill] sm:$0xff] %v5626_v11  ;;  %v5644_v15 = vrot.slane %v2042_v53, %v5225_v20  ;;  %v2296_v20 = vrot.slane %v5245_v10, %v5623_v12  ;;  %v2324_v53 = vrot.slane %v5268_v51, %v5216_v17 }
 0x260   : > { %6582 = vst [vmem:[#allocation54_spill] sm:$0xff] %v5629_v9  ;;  %6583 = vst [vmem:[#allocation55_spill] sm:$0xff] %v5632_v7  ;;  %v2328_v7 = vrot.slane %v5268_v51, %v5623_v12  ;;  %v2336_v9 = vrot.slane %v5273_v52, %v5623_v12  ;;  %v2340_v11 = vrot.slane %v5278_v60, %v5216_v17 }
 0x261   : > { %6584 = vst [vmem:[#allocation56_spill] sm:$0xff] %v5635_v4  ;;  %6585 = vst [vmem:[#allocation57_spill] sm:$0xff] %v5638_v3  ;;  %v2312_v3 = vrot.slane %v5258_v49, %v5623_v12  ;;  %v2320_v4 = vrot.slane %v5263_v50, %v5623_v12  ;;  %v2368_v37 = vrot.slane %v5307_v63, %v5623_v12 }
 0x262   : > { %6586 = vst [vmem:[#allocation58_spill] sm:$0xff] %v5641_v2  ;;  %6587 = vst [vmem:[#allocation59_spill] sm:$0xff] %v5644_v15  ;;  %v2332_v15 = vrot.slane %v5273_v52, %v5216_v17  ;;  %v2304_v2 = vrot.slane %v5250_v47, %v5623_v12  ;;  %v2372_v34 = vrot.slane %v5312_v0, %v5216_v17 }
 0x263   : > { %v2376_v33 = vrot.slane %v5312_v0, %v5623_v12  ;;  %v2380_v32 = vrot.slane %v5325_v5, %v5216_v17  ;;  %v2384_v18 = vrot.slane %v5325_v5, %v5623_v12  ;;  %v2388_v30 = vrot.slane %v5330_v6, %v5216_v17 }
 0x264   : > { %v2392_v38 = vrot.slane %v5330_v6, %v5623_v12  ;;  %v2396_v29 = vrot.slane %v5343_v14, %v5216_v17  ;;  %v2400_v28 = vrot.slane %v5343_v14, %v5623_v12  ;;  %v2404_v27 = vrot.slane %v5348_v31, %v5216_v17 }
 0x265   : > { %v2408_v35 = vrot.slane %v5348_v31, %v5623_v12  ;;  %v5711_v1 = vrot.slane %v2284_v61, %v5216_v17  ;;  %v5714_v43 = vrot.slane %v2288_v54, %v5216_v17  ;;  %v5717_v44 = vrot.slane %v2292_v59, %v5216_v17 }
 0x266   : > { %v5720_v45 = vrot.slane %v2296_v20, %v5216_v17  ;;  %v5723_v25 = vrot.slane %v2300_v58, %v5216_v17  ;;  %v5726_v8 = vrot.slane %v2304_v2, %v5216_v17  ;;  %v5729_v12 = vrot.slane %v2308_v57, %v5216_v17 }
 0x267   : > { %v5732_v61 = vrot.slane %v2312_v3, %v5216_v17  ;;  %v5735_v54 = vrot.slane %v2316_v55, %v5216_v17  ;;  %v5738_v59 = vrot.slane %v2320_v4, %v5216_v17  ;;  %v5741_v20 = vrot.slane %v2324_v53, %v5216_v17 }
 0x268   : > { %v5744_v58 = vrot.slane %v2328_v7, %v5216_v17  ;;  %v5747_v2 = vrot.slane %v2332_v15, %v5216_v17  ;;  %v5750_v57 = vrot.slane %v2336_v9, %v5216_v17  ;;  %v5753_v3 = vrot.slane %v2340_v11, %v5216_v17 }
 0x269   : > { %v5756_v55 = vrot.slane %v2344_v16, %v5216_v17  ;;  %v5759_v4 = vrot.slane %v2348_v36, %v5216_v17  ;;  %v5762_v53 = vrot.slane %v2352_v21, %v5216_v17  ;;  %v5765_v7 = vrot.slane %v2356_v23, %v5216_v17 }
 0x26a   : > { %v5768_v15 = vrot.slane %v2360_v24, %v5216_v17  ;;  %v5771_v9 = vrot.slane %v2364_v26, %v5216_v17  ;;  %v5774_v11 = vrot.slane %v2368_v37, %v5216_v17  ;;  %v5777_v16 = vrot.slane %v2372_v34, %v5216_v17 }
 0x26b   : > { %6588 = vst [vmem:[#allocation60_spill] sm:$0xff] %v5762_v53  ;;  %6589 = vst [vmem:[#allocation61_spill] sm:$0xff] %v5765_v7  ;;  %v5780_v36 = vrot.slane %v2376_v33, %v5216_v17  ;;  %v5783_v21 = vsub.s32 7, %v5213_v13  ;;  %v5786_v23 = vrot.slane %v2380_v32, %v5216_v17  ;;  %v5789_v24 = vrot.slane %v2384_v18, %v5216_v17 }
 0x26c   : > { %6590 = vst [vmem:[#allocation62_spill] sm:$0xff] %v5768_v15  ;;  %6591 = vst [vmem:[#allocation63_spill] sm:$0xff] %v5771_v9  ;;  %v5792_v26 = vrot.slane %v2388_v30, %v5216_v17  ;;  %v5795_v37 = vrot.slane %v2392_v38, %v5216_v17  ;;  %v5798_v34 = vrot.slane %v2396_v29, %v5216_v17 }
 0x26d   : > { %6592 = vst [vmem:[#allocation64_spill] sm:$0xff] %v5774_v11  ;;  %6593 = vst [vmem:[#allocation65_spill] sm:$0xff] %v5777_v16  ;;  %v5801_v33 = vrot.slane %v2400_v28, %v5216_v17  ;;  %v5804_v13 = vrot.slane %v2404_v27, %v5216_v17  ;;  %v5807_v32 = vrot.slane %v2408_v35, %v5216_v17 }
 0x26e   : > { %6594 = vst [vmem:[#allocation66_spill] sm:$0xff] %v5780_v36  ;;  %6595 = vst [vmem:[#allocation67_spill] sm:$0xff] %v5786_v23  ;;  %v2650_v18 = vrot.slane %v5240_v46, %v5222_v19  ;;  %v2658_v30 = vrot.slane %v5245_v10, %v5222_v19  ;;  %v2666_v38 = vrot.slane %v5250_v47, %v5222_v19 }
 0x26f   : > { %6596 = vst [vmem:[#allocation68_spill] sm:$0xff] %v5789_v24  ;;  %6597 = vst [vmem:[#allocation69_spill] sm:$0xff] %v5792_v26  ;;  %v2674_v29 = vrot.slane %v5258_v49, %v5222_v19  ;;  %v2654_v28 = vrot.slane %v5240_v46, %v5783_v21  ;;  %v2662_v27 = vrot.slane %v5245_v10, %v5783_v21 }
 0x270   : > { %6598 = vst [vmem:[#allocation70_spill] sm:$0xff] %v5795_v37  ;;  %6599 = vst [vmem:[#allocation71_spill] sm:$0xff] %v5798_v34  ;;  %v2682_v17 = vrot.slane %v5263_v50, %v5222_v19  ;;  %v2690_v35 = vrot.slane %v5268_v51, %v5222_v19  ;;  %v2694_v46 = vrot.slane %v5268_v51, %v5783_v21 }
 0x271   : > { %6600 = vst [vmem:[#allocation72_spill] sm:$0xff] %v5801_v33  ;;  %6601 = vst [vmem:[#allocation73_spill] sm:$0xff] %v5804_v13  ;;  %v2678_v13 = vrot.slane %v5258_v49, %v5783_v21  ;;  %v2686_v33 = vrot.slane %v5263_v50, %v5783_v21  ;;  %v2698_v10 = vrot.slane %v5273_v52, %v5222_v19 }
 0x272   : > { %6602 = vst [vmem:[#allocation74_spill] sm:$0xff] %v5807_v32  ;;  %v2670_v32 = vrot.slane %v5250_v47, %v5783_v21  ;;  %v2702_v34 = vrot.slane %v5273_v52, %v5783_v21  ;;  %v2706_v37 = vrot.slane %v5278_v60, %v5222_v19  ;;  %v2710_v47 = vrot.slane %v5278_v60, %v5783_v21 }
 0x273   : > { %v2714_v49 = vrot.slane %v5289_v62, %v5222_v19  ;;  %v2718_v50 = vrot.slane %v5289_v62, %v5783_v21  ;;  %v2722_v51 = vrot.slane %v5294_v56, %v5222_v19  ;;  %v2726_v26 = vrot.slane %v5294_v56, %v5783_v21 }
 0x274   : > { %v2730_v52 = vrot.slane %v5307_v63, %v5222_v19  ;;  %v2734_v24 = vrot.slane %v5307_v63, %v5783_v21  ;;  %v2738_v60 = vrot.slane %v5312_v0, %v5222_v19  ;;  %v2742_v23 = vrot.slane %v5312_v0, %v5783_v21 }
 0x275   : > { %v2746_v62 = vrot.slane %v5325_v5, %v5222_v19  ;;  %v2750_v36 = vrot.slane %v5325_v5, %v5783_v21  ;;  %v2754_v56 = vrot.slane %v5330_v6, %v5222_v19  ;;  %v2758_v16 = vrot.slane %v5330_v6, %v5783_v21 }
 0x276   : > { %v2762_v63 = vrot.slane %v5343_v14, %v5222_v19  ;;  %v2766_v11 = vrot.slane %v5343_v14, %v5783_v21  ;;  %v2770_v0 = vrot.slane %v5348_v31, %v5222_v19  ;;  %v2774_v9 = vrot.slane %v5348_v31, %v5783_v21 }
 0x277   : > { %v5874_v5 = vrot.slane %v2650_v18, %v5222_v19  ;;  %v5877_v15 = vrot.slane %v2654_v28, %v5222_v19  ;;  %v5880_v6 = vrot.slane %v2658_v30, %v5222_v19  ;;  %v5883_v7 = vrot.slane %v2662_v27, %v5222_v19 }
 0x278   : > { %v5886_v14 = vrot.slane %v2666_v38, %v5222_v19  ;;  %v5889_v53 = vrot.slane %v2670_v32, %v5222_v19  ;;  %v5892_v31 = vrot.slane %v2674_v29, %v5222_v19  ;;  %v5895_v21 = vrot.slane %v2678_v13, %v5222_v19 }
 0x279   : > { %6603 = vst [vmem:[#allocation75_spill] sm:$0xff] %v5874_v5  ;;  %6604 = vst [vmem:[#allocation76_spill] sm:$0xff] %v5877_v15  ;;  %v5898_v18 = vrot.slane %v2682_v17, %v5222_v19  ;;  %v5901_v30 = vrot.slane %v2686_v33, %v5222_v19  ;;  %v5904_v28 = vrot.slane %v2690_v35, %v5222_v19 }
 0x27a   : > { %6605 = vst [vmem:[#allocation77_spill] sm:$0xff] %v5880_v6  ;;  %6606 = vst [vmem:[#allocation78_spill] sm:$0xff] %v5883_v7  ;;  %v5907_v38 = vrot.slane %v2694_v46, %v5222_v19  ;;  %v5910_v32 = vrot.slane %v2698_v10, %v5222_v19  ;;  %v5913_v29 = vrot.slane %v2702_v34, %v5222_v19 }
 0x27b   : > { %6607 = vst [vmem:[#allocation79_spill] sm:$0xff] %v5886_v14  ;;  %6608 = vst [vmem:[#allocation80_spill] sm:$0xff] %v5889_v53  ;;  %v5916_v13 = vrot.slane %v2706_v37, %v5222_v19  ;;  %v5919_v27 = vrot.slane %v2710_v47, %v5222_v19  ;;  %v5922_v33 = vrot.slane %v2714_v49, %v5222_v19 }
 0x27c   : > { %6609 = vst [vmem:[#allocation81_spill] sm:$0xff] %v5892_v31  ;;  %6610 = vst [vmem:[#allocation82_spill] sm:$0xff] %v5895_v21  ;;  %v5925_v17 = vrot.slane %v2718_v50, %v5222_v19  ;;  %v5928_v35 = vrot.slane %v2722_v51, %v5222_v19  ;;  %v5931_v46 = vrot.slane %v2726_v26, %v5222_v19 }
 0x27d   : > { %6611 = vst [vmem:[#allocation83_spill] sm:$0xff] %v5898_v18  ;;  %6612 = vst [vmem:[#allocation84_spill] sm:$0xff] %v5901_v30  ;;  %v5934_v34 = vrot.slane %v2730_v52, %v5222_v19  ;;  %v5937_v37 = vrot.slane %v2734_v24, %v5222_v19  ;;  %v5940_v10 = vrot.slane %v2738_v60, %v5222_v19 }
 0x27e   : > { %6613 = vst [vmem:[#allocation85_spill] sm:$0xff] %v5904_v28  ;;  %6614 = vst [vmem:[#allocation86_spill] sm:$0xff] %v5907_v38  ;;  %v5943_v47 = vrot.slane %v2742_v23, %v5222_v19  ;;  %v5946_v49 = vrot.slane %v2746_v62, %v5222_v19  ;;  %v5949_v50 = vrot.slane %v2750_v36, %v5222_v19 }
 0x27f   : > { %6615 = vst [vmem:[#allocation87_spill] sm:$0xff] %v5910_v32  ;;  %6616 = vst [vmem:[#allocation88_spill] sm:$0xff] %v5913_v29  ;;  %v5952_v26 = vrot.slane %v2754_v56, %v5222_v19  ;;  %v5955_v51 = vrot.slane %v2758_v16, %v5222_v19  ;;  %v5958_v52 = vrot.slane %v2762_v63, %v5222_v19  ;;  %v6662_v29 = vld [vmem:[#allocation21_spill] sm:$0xff] }
 0x280   : > { %6617 = vst [vmem:[#allocation89_spill] sm:$0xff] %v5916_v13  ;;  %6618 = vst [vmem:[#allocation90_spill] sm:$0xff] %v5919_v27  ;;  %v5961_v60 = vrot.slane %v2766_v11, %v5222_v19  ;;  %v5964_v23 = vrot.slane %v2770_v0, %v5222_v19  ;;  %v5967_v62 = vrot.slane %v2774_v9, %v5222_v19  ;;  %v6635_v0 = vld [vmem:[#allocation2_spill] sm:$0xff]  ;;  %v6636_v19 = vld [vmem:[#allocation3_spill] sm:$0xff] }
 0x281   : > { %6619 = vst [vmem:[#allocation91_spill] sm:$0xff] %v5922_v33  ;;  %6620 = vst [vmem:[#allocation92_spill] sm:$0xff] %v5925_v17 }
 0x282   : > { %6621 = vst [vmem:[#allocation93_spill] sm:$0xff] %v5928_v35  ;;  %6622 = vst [vmem:[#allocation94_spill] sm:$0xff] %v5931_v46 }
 0x283   : > { %6623 = vst [vmem:[#allocation95_spill] sm:$0xff] %v5934_v34  ;;  %6624 = vst [vmem:[#allocation96_spill] sm:$0xff] %v5937_v37 }
 0x284   : > { %6625 = vst [vmem:[#allocation97_spill] sm:$0xff] %v5940_v10  ;;  %6626 = vst [vmem:[#allocation98_spill] sm:$0xff] %v5943_v47 }
 0x285   : > { %6627 = vst [vmem:[#allocation99_spill] sm:$0xff] %v5946_v49  ;;  %6628 = vst [vmem:[#allocation100_spill] sm:$0xff] %v5949_v50 }
 0x286   : > { %6629 = vst [vmem:[#allocation101_spill] sm:$0xff] %v5952_v26  ;;  %6630 = vst [vmem:[#allocation102_spill] sm:$0xff] %v5955_v51 }
 0x287   : > { %6631 = vst [vmem:[#allocation103_spill] sm:$0xff] %v5958_v52  ;;  %6632 = vst [vmem:[#allocation104_spill] sm:$0xff] %v5961_v60 }
 0x288   : > { %6633 = vst [vmem:[#allocation105_spill] sm:$0xff] %v5964_v23  ;;  %6634 = vst [vmem:[#allocation106_spill] sm:$0xff] %v5967_v62 }
 0x2c1   : > { %v1563_v24 = vpop.permute.xlu0 %1562 }
 0x2c2   : > { %v5970_v36 = vmul.f32 %v5385_v39, %v1563_v24  ;;  %v5973_v56 = vmul.f32 %v5388_v40, %v1563_v24  ;;  %v5976_v16 = vmul.f32 %v5391_v41, %v1563_v24  ;;  %v5979_v63 = vmul.f32 %v5394_v42, %v1563_v24  ;;  %v6637_v39 = vld [vmem:[#allocation4_spill] sm:$0xff]  ;;  %v6638_v40 = vld [vmem:[#allocation5_spill] sm:$0xff]  ;;  %v6639_v41 = vld [vmem:[#allocation6_spill] sm:$0xff] }
 0x2c3   : > { %v5982_v11 = vmul.f32 %v5397_v22, %v1563_v24  ;;  %v5985_v23 = vmul.f32 %v6635_v0, %v1563_v24  ;;  %v5988_v9 = vmul.f32 %v6636_v19, %v1563_v24  ;;  %v5991_v62 = vmul.f32 %v6637_v39, %v1563_v24  ;;  %v6640_v42 = vld [vmem:[#allocation7_spill] sm:$0xff]  ;;  %v6641_v22 = vld [vmem:[#allocation8_spill] sm:$0xff]  ;;  %v6642_v0 = vld [vmem:[#allocation9_spill] sm:$0xff] }
 0x2c4   : > { %v5994_v60 = vmul.f32 %v6638_v40, %v1563_v24  ;;  %v5997_v52 = vmul.f32 %v6639_v41, %v1563_v24  ;;  %v6000_v51 = vmul.f32 %v6640_v42, %v1563_v24  ;;  %v6003_v26 = vmul.f32 %v6641_v22, %v1563_v24  ;;  %v6643_v19 = vld [vmem:[#allocation10_spill] sm:$0xff]  ;;  %v6644_v39 = vld [vmem:[#allocation11_spill] sm:$0xff]  ;;  %v6645_v40 = vld [vmem:[#allocation12_spill] sm:$0xff] }
 0x2c5   : > { %v6006_v50 = vmul.f32 %v6642_v0, %v1563_v24  ;;  %v6009_v49 = vmul.f32 %v6643_v19, %v1563_v24  ;;  %v6012_v47 = vmul.f32 %v6644_v39, %v1563_v24  ;;  %v6015_v10 = vmul.f32 %v6645_v40, %v1563_v24  ;;  %v6646_v41 = vld [vmem:[#allocation13_spill] sm:$0xff]  ;;  %v6648_v42 = vld [vmem:[#allocation14_spill] sm:$0xff]  ;;  %v6650_v22 = vld [vmem:[#allocation15_spill] sm:$0xff] }
 0x2c6   : > { %v6018_v37 = vmul.f32 %v6646_v41, %v1563_v24  ;;  %v6021_v34 = vmul.f32 %v6648_v42, %v1563_v24  ;;  %v6024_v46 = vmul.f32 %v6650_v22, %v1563_v24  ;;  %v6652_v0 = vld [vmem:[#allocation16_spill] sm:$0xff]  ;;  %v6654_v19 = vld [vmem:[#allocation17_spill] sm:$0xff]  ;;  %v6656_v39 = vld [vmem:[#allocation18_spill] sm:$0xff]  ;;  %v1913_v42 = vpop.permute.xlu1 %1912  ;;  %v6042_v32 = vmul.f32 %v6662_v29, %v1563_v24 }
 0x2c7   : > { %v6027_v35 = vmul.f32 %v6652_v0, %v1563_v24  ;;  %v6030_v17 = vmul.f32 %v6654_v19, %v1563_v24  ;;  %v6033_v33 = vmul.f32 %v6656_v39, %v1563_v24  ;;  %v6658_v40 = vld [vmem:[#allocation19_spill] sm:$0xff]  ;;  %v6660_v41 = vld [vmem:[#allocation20_spill] sm:$0xff]  ;;  %v6664_v22 = vld [vmem:[#allocation22_spill] sm:$0xff] }
 0x2c8   : > { %6647 = vst [vmem:[#allocation2_spill] sm:$0xff] %v6018_v37  ;;  %6649 = vst [vmem:[#allocation3_spill] sm:$0xff] %v6021_v34  ;;  %v6036_v27 = vmul.f32 %v6658_v40, %v1563_v24  ;;  %v6039_v13 = vmul.f32 %v6660_v41, %v1563_v24  ;;  %v6045_v38 = vmul.f32 %v6664_v22, %v1563_v24  ;;  %v6666_v0 = vld [vmem:[#allocation23_spill] sm:$0xff]  ;;  %v6668_v19 = vld [vmem:[#allocation24_spill] sm:$0xff] }
 0x2c9   : > { %6651 = vst [vmem:[#allocation4_spill] sm:$0xff] %v6024_v46  ;;  %6653 = vst [vmem:[#allocation5_spill] sm:$0xff] %v6027_v35  ;;  %v6048_v28 = vmul.f32 %v6666_v0, %v1563_v24  ;;  %v6051_v30 = vmul.f32 %v6668_v19, %v1563_v24  ;;  %v6670_v39 = vld [vmem:[#allocation25_spill] sm:$0xff]  ;;  %v6672_v40 = vld [vmem:[#allocation26_spill] sm:$0xff]  ;;  %v6066_v22 = vmul.f32 %v5548_v48, %v1913_v42 }
 0x2ca   : > { %6655 = vst [vmem:[#allocation6_spill] sm:$0xff] %v6030_v17  ;;  %6657 = vst [vmem:[#allocation7_spill] sm:$0xff] %v6033_v33  ;;  %v6054_v18 = vmul.f32 %v6670_v39, %v1563_v24  ;;  %v6057_v21 = vmul.f32 %v6672_v40, %v1563_v24  ;;  %v6674_v41 = vld [vmem:[#allocation27_spill] sm:$0xff]  ;;  %v6676_v29 = vld [vmem:[#allocation28_spill] sm:$0xff] }
 0x2cb   : > { %6659 = vst [vmem:[#allocation8_spill] sm:$0xff] %v6036_v27  ;;  %6661 = vst [vmem:[#allocation9_spill] sm:$0xff] %v6039_v13  ;;  %v6060_v31 = vmul.f32 %v6674_v41, %v1563_v24  ;;  %v6063_v53 = vmul.f32 %v6676_v29, %v1563_v24  ;;  %v6678_v0 = vld [vmem:[#allocation29_spill] sm:$0xff]  ;;  %v6679_v19 = vld [vmem:[#allocation30_spill] sm:$0xff] }
 0x2cc   : > { %6663 = vst [vmem:[#allocation10_spill] sm:$0xff] %v6042_v32  ;;  %6665 = vst [vmem:[#allocation11_spill] sm:$0xff] %v6045_v38  ;;  %v6069_v14 = vmul.f32 %v6678_v0, %v1913_v42  ;;  %v6072_v7 = vmul.f32 %v6679_v19, %v1913_v42  ;;  %v6680_v39 = vld [vmem:[#allocation31_spill] sm:$0xff]  ;;  %v6681_v40 = vld [vmem:[#allocation32_spill] sm:$0xff] }
 0x2cd   : > { %6667 = vst [vmem:[#allocation12_spill] sm:$0xff] %v6048_v28  ;;  %6669 = vst [vmem:[#allocation13_spill] sm:$0xff] %v6051_v30  ;;  %v6075_v6 = vmul.f32 %v6680_v39, %v1913_v42  ;;  %v6078_v15 = vmul.f32 %v6681_v40, %v1913_v42  ;;  %v6682_v41 = vld [vmem:[#allocation33_spill] sm:$0xff]  ;;  %v6683_v24 = vld [vmem:[#allocation34_spill] sm:$0xff] }
 0x2ce   : > { %6671 = vst [vmem:[#allocation14_spill] sm:$0xff] %v6054_v18  ;;  %6673 = vst [vmem:[#allocation15_spill] sm:$0xff] %v6057_v21  ;;  %v6081_v5 = vmul.f32 %v6682_v41, %v1913_v42  ;;  %v6084_v29 = vmul.f32 %v6683_v24, %v1913_v42  ;;  %v6684_v48 = vld [vmem:[#allocation35_spill] sm:$0xff]  ;;  %v6685_v0 = vld [vmem:[#allocation36_spill] sm:$0xff] }
 0x2cf   : > { %6675 = vst [vmem:[#allocation16_spill] sm:$0xff] %v6060_v31  ;;  %6677 = vst [vmem:[#allocation17_spill] sm:$0xff] %v6063_v53  ;;  %v6087_v53 = vmul.f32 %v6684_v48, %v1913_v42  ;;  %v6090_v31 = vmul.f32 %v6685_v0, %v1913_v42  ;;  %v6686_v19 = vld [vmem:[#allocation37_spill] sm:$0xff]  ;;  %v6687_v39 = vld [vmem:[#allocation38_spill] sm:$0xff] }
 0x2d0   : > { %v6093_v21 = vmul.f32 %v6686_v19, %v1913_v42  ;;  %v6096_v18 = vmul.f32 %v6687_v39, %v1913_v42  ;;  %v6688_v40 = vld [vmem:[#allocation39_spill] sm:$0xff]  ;;  %v6689_v41 = vld [vmem:[#allocation40_spill] sm:$0xff]  ;;  %v6690_v24 = vld [vmem:[#allocation41_spill] sm:$0xff] }
 0x2d1   : > { %v6099_v30 = vmul.f32 %v6688_v40, %v1913_v42  ;;  %v6102_v28 = vmul.f32 %v6689_v41, %v1913_v42  ;;  %v6105_v38 = vmul.f32 %v6690_v24, %v1913_v42  ;;  %v6691_v48 = vld [vmem:[#allocation42_spill] sm:$0xff]  ;;  %v6692_v0 = vld [vmem:[#allocation43_spill] sm:$0xff]  ;;  %v6694_v19 = vld [vmem:[#allocation44_spill] sm:$0xff]  ;;  %v2279_v24 = vpop.permute.xlu1 %2278 }
 0x2d2   : > { %v6108_v32 = vmul.f32 %v6691_v48, %v1913_v42  ;;  %v6111_v13 = vmul.f32 %v6692_v0, %v1913_v42  ;;  %v6114_v27 = vmul.f32 %v6694_v19, %v1913_v42  ;;  %v6696_v39 = vld [vmem:[#allocation45_spill] sm:$0xff]  ;;  %v6698_v40 = vld [vmem:[#allocation46_spill] sm:$0xff]  ;;  %v6700_v41 = vld [vmem:[#allocation47_spill] sm:$0xff] }
 0x2d3   : > { %v6117_v33 = vmul.f32 %v6696_v39, %v1913_v42  ;;  %v6120_v17 = vmul.f32 %v6698_v40, %v1913_v42  ;;  %v6123_v35 = vmul.f32 %v6700_v41, %v1913_v42  ;;  %v6702_v46 = vld [vmem:[#allocation48_spill] sm:$0xff]  ;;  %v6704_v48 = vld [vmem:[#allocation49_spill] sm:$0xff]  ;;  %v6706_v0 = vld [vmem:[#allocation50_spill] sm:$0xff] }
 0x2d4   : > { %6693 = vst [vmem:[#allocation18_spill] sm:$0xff] %v6111_v13  ;;  %6695 = vst [vmem:[#allocation19_spill] sm:$0xff] %v6114_v27  ;;  %v6126_v34 = vmul.f32 %v6702_v46, %v1913_v42  ;;  %v6129_v37 = vmul.f32 %v6704_v48, %v1913_v42  ;;  %v6132_v13 = vmul.f32 %v6706_v0, %v1913_v42  ;;  %v6708_v19 = vld [vmem:[#allocation51_spill] sm:$0xff]  ;;  %v6710_v39 = vld [vmem:[#allocation52_spill] sm:$0xff] }
 0x2d5   : > { %6697 = vst [vmem:[#allocation20_spill] sm:$0xff] %v6117_v33  ;;  %6699 = vst [vmem:[#allocation21_spill] sm:$0xff] %v6120_v17  ;;  %v6135_v27 = vmul.f32 %v6708_v19, %v1913_v42  ;;  %v6138_v33 = vmul.f32 %v6710_v39, %v1913_v42  ;;  %v6712_v40 = vld [vmem:[#allocation53_spill] sm:$0xff]  ;;  %v6713_v41 = vld [vmem:[#allocation54_spill] sm:$0xff] }
 0x2d6   : > { %6701 = vst [vmem:[#allocation22_spill] sm:$0xff] %v6123_v35  ;;  %6703 = vst [vmem:[#allocation23_spill] sm:$0xff] %v6126_v34  ;;  %v6141_v17 = vmul.f32 %v6712_v40, %v1913_v42  ;;  %v6144_v35 = vmul.f32 %v6713_v41, %v1913_v42  ;;  %v6714_v46 = vld [vmem:[#allocation55_spill] sm:$0xff]  ;;  %v6715_v48 = vld [vmem:[#allocation56_spill] sm:$0xff]  ;;  %v6162_v40 = vmul.f32 %v5711_v1, %v2279_v24 }
 0x2d7   : > { %6705 = vst [vmem:[#allocation24_spill] sm:$0xff] %v6129_v37  ;;  %6707 = vst [vmem:[#allocation25_spill] sm:$0xff] %v6132_v13  ;;  %v6147_v34 = vmul.f32 %v6714_v46, %v1913_v42  ;;  %v6150_v37 = vmul.f32 %v6715_v48, %v1913_v42  ;;  %v6716_v0 = vld [vmem:[#allocation57_spill] sm:$0xff]  ;;  %v6717_v19 = vld [vmem:[#allocation58_spill] sm:$0xff]  ;;  %v6165_v41 = vmul.f32 %v5714_v43, %v2279_v24 }
 0x2d8   : > { %6709 = vst [vmem:[#allocation26_spill] sm:$0xff] %v6135_v27  ;;  %6711 = vst [vmem:[#allocation27_spill] sm:$0xff] %v6138_v33  ;;  %v6153_v13 = vmul.f32 %v6716_v0, %v1913_v42  ;;  %v6156_v27 = vmul.f32 %v6717_v19, %v1913_v42  ;;  %v6718_v39 = vld [vmem:[#allocation59_spill] sm:$0xff]  ;;  %v6168_v46 = vmul.f32 %v5717_v44, %v2279_v24 }
 0x2d9   : > { %v6159_v33 = vmul.f32 %v6718_v39, %v1913_v42  ;;  %v6171_v48 = vmul.f32 %v5720_v45, %v2279_v24  ;;  %v6174_v0 = vmul.f32 %v5723_v25, %v2279_v24  ;;  %v6177_v19 = vmul.f32 %v5726_v8, %v2279_v24 }
 0x2da   : > { %v6180_v42 = vmul.f32 %v5729_v12, %v2279_v24  ;;  %v6183_v1 = vmul.f32 %v5732_v61, %v2279_v24  ;;  %v6186_v43 = vmul.f32 %v5735_v54, %v2279_v24  ;;  %v6189_v44 = vmul.f32 %v5738_v59, %v2279_v24 }
 0x2db   : > { %v6192_v45 = vmul.f32 %v5741_v20, %v2279_v24  ;;  %v6195_v25 = vmul.f32 %v5744_v58, %v2279_v24  ;;  %v6198_v8 = vmul.f32 %v5747_v2, %v2279_v24  ;;  %v6201_v12 = vmul.f32 %v5750_v57, %v2279_v24  ;;  %v6725_v20 = vld [vmem:[#allocation60_spill] sm:$0xff]  ;;  %v6727_v58 = vld [vmem:[#allocation61_spill] sm:$0xff]  ;;  %v6729_v2 = vld [vmem:[#allocation62_spill] sm:$0xff] }
 0x2dc   : > { %v6204_v61 = vmul.f32 %v5753_v3, %v2279_v24  ;;  %v6207_v54 = vmul.f32 %v5756_v55, %v2279_v24  ;;  %v6210_v59 = vmul.f32 %v5759_v4, %v2279_v24  ;;  %v6213_v39 = vmul.f32 %v6725_v20, %v2279_v24  ;;  %v6731_v57 = vld [vmem:[#allocation63_spill] sm:$0xff]  ;;  %v6733_v3 = vld [vmem:[#allocation64_spill] sm:$0xff]  ;;  %v6735_v55 = vld [vmem:[#allocation65_spill] sm:$0xff] }
 0x2dd   : > { %6719 = vst [vmem:[#allocation28_spill] sm:$0xff] %v6195_v25  ;;  %6720 = vst [vmem:[#allocation29_spill] sm:$0xff] %v6198_v8  ;;  %v6216_v25 = vmul.f32 %v6727_v58, %v2279_v24  ;;  %v6219_v8 = vmul.f32 %v6729_v2, %v2279_v24  ;;  %v6737_v4 = vld [vmem:[#allocation66_spill] sm:$0xff]  ;;  %v6739_v20 = vld [vmem:[#allocation67_spill] sm:$0xff] }
 0x2de   : > { %6721 = vst [vmem:[#allocation30_spill] sm:$0xff] %v6201_v12  ;;  %6722 = vst [vmem:[#allocation31_spill] sm:$0xff] %v6204_v61  ;;  %v6222_v12 = vmul.f32 %v6731_v57, %v2279_v24  ;;  %v6225_v61 = vmul.f32 %v6733_v3, %v2279_v24  ;;  %v6741_v58 = vld [vmem:[#allocation68_spill] sm:$0xff]  ;;  %v6742_v2 = vld [vmem:[#allocation69_spill] sm:$0xff] }
 0x2df   : > { %6723 = vst [vmem:[#allocation32_spill] sm:$0xff] %v6207_v54  ;;  %6724 = vst [vmem:[#allocation33_spill] sm:$0xff] %v6210_v59  ;;  %v6228_v54 = vmul.f32 %v6735_v55, %v2279_v24  ;;  %v6231_v59 = vmul.f32 %v6737_v4, %v2279_v24  ;;  %v6743_v57 = vld [vmem:[#allocation70_spill] sm:$0xff]  ;;  %v6744_v3 = vld [vmem:[#allocation71_spill] sm:$0xff] }
 0x2e0   : > { %6726 = vst [vmem:[#allocation34_spill] sm:$0xff] %v6213_v39  ;;  %6728 = vst [vmem:[#allocation35_spill] sm:$0xff] %v6216_v25  ;;  %v6234_v39 = vmul.f32 %v6739_v20, %v2279_v24  ;;  %v6237_v25 = vmul.f32 %v6741_v58, %v2279_v24  ;;  %v6745_v55 = vld [vmem:[#allocation72_spill] sm:$0xff]  ;;  %v6746_v4 = vld [vmem:[#allocation73_spill] sm:$0xff]  ;;  %v2235_v58 = vadd.f32 %v6066_v22, %v5970_v36 }
 0x2e1   : > { %6730 = vst [vmem:[#allocation36_spill] sm:$0xff] %v6219_v8  ;;  %6732 = vst [vmem:[#allocation37_spill] sm:$0xff] %v6222_v12  ;;  %v6240_v8 = vmul.f32 %v6742_v2, %v2279_v24  ;;  %v6243_v12 = vmul.f32 %v6743_v57, %v2279_v24  ;;  %v6747_v20 = vld [vmem:[#allocation74_spill] sm:$0xff]  ;;  %v2236_v2 = vadd.f32 %v6069_v14, %v5973_v56  ;;  %v6752_v56 = vld [vmem:[#allocation3_spill] sm:$0xff] }
 0x2e2   : > { %6734 = vst [vmem:[#allocation38_spill] sm:$0xff] %v6225_v61  ;;  %6736 = vst [vmem:[#allocation39_spill] sm:$0xff] %v6228_v54  ;;  %v6246_v61 = vmul.f32 %v6744_v3, %v2279_v24  ;;  %v6249_v54 = vmul.f32 %v6745_v55, %v2279_v24  ;;  %v2237_v57 = vadd.f32 %v6072_v7, %v5976_v16  ;;  %v6754_v16 = vld [vmem:[#allocation4_spill] sm:$0xff] }
 0x2e3   : > { %6738 = vst [vmem:[#allocation40_spill] sm:$0xff] %v6231_v59  ;;  %6740 = vst [vmem:[#allocation41_spill] sm:$0xff] %v6234_v39  ;;  %v6252_v59 = vmul.f32 %v6746_v4, %v2279_v24  ;;  %v6255_v39 = vmul.f32 %v6747_v20, %v2279_v24  ;;  %v2238_v3 = vadd.f32 %v6075_v6, %v5979_v63  ;;  %v6756_v63 = vld [vmem:[#allocation5_spill] sm:$0xff]  ;;  %v6762_v22 = vld [vmem:[#allocation8_spill] sm:$0xff] }
 0x2e4   : > { %v2239_v55 = vadd.f32 %v6078_v15, %v5982_v11  ;;  %v2240_v4 = vadd.f32 %v6081_v5, %v5985_v23  ;;  %v2241_v24 = vadd.f32 %v6084_v29, %v5988_v9  ;;  %v2242_v36 = vadd.f32 %v6087_v53, %v5991_v62  ;;  %v6750_v62 = vld [vmem:[#allocation2_spill] sm:$0xff]  ;;  %v6760_v9 = vld [vmem:[#allocation7_spill] sm:$0xff]  ;;  %v6764_v20 = vld [vmem:[#allocation9_spill] sm:$0xff] }
 0x2e5   : > { %6748 = vst [vmem:[#allocation42_spill] sm:$0xff] %v6255_v39  ;;  %v2243_v14 = vadd.f32 %v6090_v31, %v5994_v60  ;;  %v2244_v7 = vadd.f32 %v6093_v21, %v5997_v52  ;;  %v2245_v6 = vadd.f32 %v6096_v18, %v6000_v51  ;;  %v2246_v15 = vadd.f32 %v6099_v30, %v6003_v26  ;;  %v6749_v31 = vld [vmem:[#allocation18_spill] sm:$0xff]  ;;  %v6751_v21 = vld [vmem:[#allocation19_spill] sm:$0xff]  ;;  %v6753_v18 = vld [vmem:[#allocation20_spill] sm:$0xff] }
 0x2e6   : > { %v2247_v5 = vadd.f32 %v6102_v28, %v6006_v50  ;;  %v2248_v23 = vadd.f32 %v6105_v38, %v6009_v49  ;;  %v2249_v53 = vadd.f32 %v6108_v32, %v6012_v47  ;;  %v2250_v60 = vadd.f32 %v6749_v31, %v6015_v10  ;;  %v6755_v30 = vld [vmem:[#allocation21_spill] sm:$0xff]  ;;  %v6757_v28 = vld [vmem:[#allocation22_spill] sm:$0xff]  ;;  %v6759_v38 = vld [vmem:[#allocation23_spill] sm:$0xff] }
 0x2e7   : > { %v2251_v52 = vadd.f32 %v6751_v21, %v6750_v62  ;;  %v2252_v51 = vadd.f32 %v6753_v18, %v6752_v56  ;;  %v2253_v26 = vadd.f32 %v6755_v30, %v6754_v16  ;;  %v2254_v50 = vadd.f32 %v6757_v28, %v6756_v63  ;;  %v6758_v11 = vld [vmem:[#allocation6_spill] sm:$0xff]  ;;  %v6761_v32 = vld [vmem:[#allocation24_spill] sm:$0xff]  ;;  %v6763_v10 = vld [vmem:[#allocation25_spill] sm:$0xff] }
 0x2e8   : > { %v2255_v49 = vadd.f32 %v6759_v38, %v6758_v11  ;;  %v2256_v47 = vadd.f32 %v6761_v32, %v6760_v9  ;;  %v2257_v29 = vadd.f32 %v6763_v10, %v6762_v22  ;;  %v6765_v31 = vld [vmem:[#allocation26_spill] sm:$0xff]  ;;  %v6767_v56 = vld [vmem:[#allocation27_spill] sm:$0xff]  ;;  %v6769_v30 = vld [vmem:[#allocation12_spill] sm:$0xff] }
 0x2e9   : > { %v2258_v62 = vadd.f32 %v6765_v31, %v6764_v20  ;;  %v6766_v21 = vld [vmem:[#allocation10_spill] sm:$0xff]  ;;  %v6768_v39 = vld [vmem:[#allocation11_spill] sm:$0xff]  ;;  %v2261_v63 = vadd.f32 %v6144_v35, %v6769_v30  ;;  %v6770_v28 = vld [vmem:[#allocation13_spill] sm:$0xff]  ;;  %v6325_v35 = vadd.f32 %v6165_v41, %v2236_v2  ;;  %v6346_v41 = vadd.f32 %v6186_v43, %v2243_v14 }
 0x2ea   : > { %v2259_v18 = vadd.f32 %v6767_v56, %v6766_v21  ;;  %v2260_v16 = vadd.f32 %v6141_v17, %v6768_v39  ;;  %v2262_v11 = vadd.f32 %v6147_v34, %v6770_v28  ;;  %v6771_v38 = vld [vmem:[#allocation14_spill] sm:$0xff]  ;;  %v6772_v32 = vld [vmem:[#allocation15_spill] sm:$0xff]  ;;  %v6773_v10 = vld [vmem:[#allocation16_spill] sm:$0xff]  ;;  %v6322_v17 = vadd.f32 %v6162_v40, %v2235_v58 }
 0x2eb   : > { %v2263_v9 = vadd.f32 %v6150_v37, %v6771_v38  ;;  %v2264_v22 = vadd.f32 %v6153_v13, %v6772_v32  ;;  %v2265_v20 = vadd.f32 %v6156_v27, %v6773_v10  ;;  %v6774_v31 = vld [vmem:[#allocation17_spill] sm:$0xff]  ;;  %v6328_v34 = vadd.f32 %v6168_v46, %v2237_v57  ;;  %v6779_v43 = vld [vmem:[#allocation32_spill] sm:$0xff] }
 0x2ec   : > { %v2266_v21 = vadd.f32 %v6159_v33, %v6774_v31  ;;  %v6331_v37 = vadd.f32 %v6171_v48, %v2238_v3  ;;  %v6334_v13 = vadd.f32 %v6174_v0, %v2239_v55  ;;  %v6337_v27 = vadd.f32 %v6177_v19, %v2240_v4  ;;  %v6775_v0 = vld [vmem:[#allocation28_spill] sm:$0xff]  ;;  %v6776_v19 = vld [vmem:[#allocation29_spill] sm:$0xff] }
 0x2ed   : > { %v6340_v33 = vadd.f32 %v6180_v42, %v2241_v24  ;;  %v6343_v40 = vadd.f32 %v6183_v1, %v2242_v36  ;;  %v6349_v46 = vadd.f32 %v6189_v44, %v2244_v7  ;;  %v6352_v48 = vadd.f32 %v6192_v45, %v2245_v6  ;;  %v6777_v42 = vld [vmem:[#allocation30_spill] sm:$0xff]  ;;  %v6778_v1 = vld [vmem:[#allocation31_spill] sm:$0xff]  ;;  %v6780_v44 = vld [vmem:[#allocation33_spill] sm:$0xff]  ;;  %v2645_v6 = vpop.permute.xlu1 %2644 }
 0x2ee   : > { %v6355_v39 = vadd.f32 %v6775_v0, %v2246_v15  ;;  %v6358_v58 = vadd.f32 %v6776_v19, %v2247_v5  ;;  %v6361_v2 = vadd.f32 %v6777_v42, %v2248_v23  ;;  %v6364_v57 = vadd.f32 %v6778_v1, %v2249_v53  ;;  %v6781_v45 = vld [vmem:[#allocation34_spill] sm:$0xff]  ;;  %v6782_v24 = vld [vmem:[#allocation35_spill] sm:$0xff]  ;;  %v6783_v14 = vld [vmem:[#allocation36_spill] sm:$0xff] }
 0x2ef   : > { %v6367_v3 = vadd.f32 %v6779_v43, %v2250_v60  ;;  %v6370_v55 = vadd.f32 %v6780_v44, %v2251_v52  ;;  %v6373_v4 = vadd.f32 %v6781_v45, %v2252_v51  ;;  %v6376_v36 = vadd.f32 %v6782_v24, %v2253_v26  ;;  %v6784_v15 = vld [vmem:[#allocation37_spill] sm:$0xff]  ;;  %v6785_v23 = vld [vmem:[#allocation38_spill] sm:$0xff]  ;;  %v6786_v60 = vld [vmem:[#allocation39_spill] sm:$0xff] }
 0x2f0   : > { %v6379_v7 = vadd.f32 %v6783_v14, %v2254_v50  ;;  %v6382_v5 = vadd.f32 %v6784_v15, %v2255_v49  ;;  %v6385_v53 = vadd.f32 %v6785_v23, %v2256_v47  ;;  %v6388_v56 = vadd.f32 %v6786_v60, %v2257_v29  ;;  %v6787_v52 = vld [vmem:[#allocation40_spill] sm:$0xff]  ;;  %v6789_v51 = vld [vmem:[#allocation41_spill] sm:$0xff]  ;;  %v6807_v19 = vld [vmem:[#allocation83_spill] sm:$0xff] }
 0x2f1   : > { %v6391_v30 = vadd.f32 %v6787_v52, %v2258_v62  ;;  %v6394_v28 = vadd.f32 %v6789_v51, %v2259_v18  ;;  %v6397_v26 = vadd.f32 %v6237_v25, %v2260_v16  ;;  %v6400_v50 = vadd.f32 %v6240_v8, %v2261_v63  ;;  %v6797_v18 = vld [vmem:[#allocation42_spill] sm:$0xff]  ;;  %v6799_v25 = vld [vmem:[#allocation75_spill] sm:$0xff]  ;;  %v6800_v32 = vld [vmem:[#allocation76_spill] sm:$0xff] }
 0x2f2   : > { %v6403_v49 = vadd.f32 %v6243_v12, %v2262_v11  ;;  %v6406_v47 = vadd.f32 %v6246_v61, %v2263_v9  ;;  %v6409_v29 = vadd.f32 %v6249_v54, %v2264_v22  ;;  %v6412_v62 = vadd.f32 %v6252_v59, %v2265_v20  ;;  %v6801_v63 = vld [vmem:[#allocation77_spill] sm:$0xff]  ;;  %v6802_v11 = vld [vmem:[#allocation78_spill] sm:$0xff]  ;;  %v6803_v61 = vld [vmem:[#allocation79_spill] sm:$0xff] }
 0x2f3   : > { %6788 = vst [vmem:[#allocation43_spill] sm:$0xff] %v6391_v30  ;;  %6790 = vst [vmem:[#allocation44_spill] sm:$0xff] %v6394_v28  ;;  %v6415_v38 = vadd.f32 %v6797_v18, %v2266_v21  ;;  %v2935_v16 = vmul.f32 %v6799_v25, %v2645_v6  ;;  %v2936_v8 = vmul.f32 %v6800_v32, %v2645_v6  ;;  %v6804_v31 = vld [vmem:[#allocation80_spill] sm:$0xff]  ;;  %v6805_v22 = vld [vmem:[#allocation81_spill] sm:$0xff] }
 0x2f4   : > { %6791 = vst [vmem:[#allocation45_spill] sm:$0xff] %v6397_v26  ;;  %6792 = vst [vmem:[#allocation46_spill] sm:$0xff] %v6400_v50  ;;  %v2937_v12 = vmul.f32 %v6801_v63, %v2645_v6  ;;  %v2938_v10 = vmul.f32 %v6802_v11, %v2645_v6  ;;  %v2939_v9 = vmul.f32 %v6803_v61, %v2645_v6  ;;  %v6806_v59 = vld [vmem:[#allocation82_spill] sm:$0xff]  ;;  %v6808_v42 = vld [vmem:[#allocation84_spill] sm:$0xff] }
 0x2f5   : > { %6793 = vst [vmem:[#allocation47_spill] sm:$0xff] %v6403_v49  ;;  %6794 = vst [vmem:[#allocation48_spill] sm:$0xff] %v6406_v47  ;;  %v2940_v54 = vmul.f32 %v6804_v31, %v2645_v6  ;;  %v2941_v0 = vmul.f32 %v6805_v22, %v2645_v6  ;;  %v2942_v20 = vmul.f32 %v6806_v59, %v2645_v6  ;;  %v6809_v43 = vld [vmem:[#allocation85_spill] sm:$0xff]  ;;  %v6810_v45 = vld [vmem:[#allocation86_spill] sm:$0xff] }
 0x2f6   : > { %6795 = vst [vmem:[#allocation49_spill] sm:$0xff] %v6409_v29  ;;  %6796 = vst [vmem:[#allocation50_spill] sm:$0xff] %v6412_v62  ;;  %v2943_v21 = vmul.f32 %v6807_v19, %v2645_v6  ;;  %v2944_v1 = vmul.f32 %v6808_v42, %v2645_v6  ;;  %v2945_v44 = vmul.f32 %v6809_v43, %v2645_v6  ;;  %v6811_v14 = vld [vmem:[#allocation87_spill] sm:$0xff]  ;;  %v6812_v23 = vld [vmem:[#allocation88_spill] sm:$0xff] }
 0x2f7   : > { %6798 = vst [vmem:[#allocation51_spill] sm:$0xff] %v6415_v38  ;;  %v2946_v24 = vmul.f32 %v6810_v45, %v2645_v6  ;;  %v2947_v15 = vmul.f32 %v6811_v14, %v2645_v6  ;;  %v2948_v60 = vmul.f32 %v6812_v23, %v2645_v6  ;;  %v6813_v52 = vld [vmem:[#allocation89_spill] sm:$0xff]  ;;  %v6814_v18 = vld [vmem:[#allocation90_spill] sm:$0xff]  ;;  %v6815_v32 = vld [vmem:[#allocation91_spill] sm:$0xff]  ;;  %v2969_v28 = vadd.f32 %v2937_v12, %v6328_v34 }
 0x2f8   : > { %v2949_v51 = vmul.f32 %v6813_v52, %v2645_v6  ;;  %v2950_v25 = vmul.f32 %v6814_v18, %v2645_v6  ;;  %v2951_v63 = vmul.f32 %v6815_v32, %v2645_v6  ;;  %v6816_v11 = vld [vmem:[#allocation92_spill] sm:$0xff]  ;;  %v6817_v31 = vld [vmem:[#allocation93_spill] sm:$0xff]  ;;  %v6818_v59 = vld [vmem:[#allocation94_spill] sm:$0xff]  ;;  %v2970_v30 = vadd.f32 %v2938_v10, %v6331_v37 }
 0x2f9   : > { %v2952_v61 = vmul.f32 %v6816_v11, %v2645_v6  ;;  %v2953_v22 = vmul.f32 %v6817_v31, %v2645_v6  ;;  %v2954_v19 = vmul.f32 %v6818_v59, %v2645_v6  ;;  %v6819_v42 = vld [vmem:[#allocation95_spill] sm:$0xff]  ;;  %v6820_v45 = vld [vmem:[#allocation96_spill] sm:$0xff]  ;;  %v6821_v14 = vld [vmem:[#allocation97_spill] sm:$0xff]  ;;  %v2977_v34 = vadd.f32 %v2945_v44, %v6352_v48  ;;  %3001 = vst [vmem:[%s6449_s18 + $0x10] sm:$0xff] %v2969_v28 }
 0x2fa   : > { %v2955_v43 = vmul.f32 %v6819_v42, %v2645_v6  ;;  %v2956_v38 = vmul.f32 %v6820_v45, %v2645_v6  ;;  %v2957_v62 = vmul.f32 %v6821_v14, %v2645_v6  ;;  %v6822_v23 = vld [vmem:[#allocation98_spill] sm:$0xff]  ;;  %v6823_v52 = vld [vmem:[#allocation99_spill] sm:$0xff]  ;;  %v6824_v18 = vld [vmem:[#allocation100_spill] sm:$0xff]  ;;  %v2978_v37 = vadd.f32 %v2946_v24, %v6355_v39  ;;  %3002 = vst [vmem:[%s6449_s18 + $0x18] sm:$0xff] %v2970_v30 }
 0x2fb   : > { %v2958_v29 = vmul.f32 %v6822_v23, %v2645_v6  ;;  %v2959_v47 = vmul.f32 %v6823_v52, %v2645_v6  ;;  %v2960_v49 = vmul.f32 %v6824_v18, %v2645_v6  ;;  %v6825_v50 = vld [vmem:[#allocation101_spill] sm:$0xff]  ;;  %v6826_v26 = vld [vmem:[#allocation102_spill] sm:$0xff]  ;;  %v6827_v31 = vld [vmem:[#allocation103_spill] sm:$0xff]  ;;  %v2985_v48 = vadd.f32 %v2953_v22, %v6376_v36  ;;  %3009 = vst [vmem:[%s6449_s18 + $0x50] sm:$0xff] %v2977_v34 }
 0x2fc   : > { %v2961_v32 = vmul.f32 %v6825_v50, %v2645_v6  ;;  %v2962_v11 = vmul.f32 %v6826_v26, %v2645_v6  ;;  %v2963_v59 = vmul.f32 %v6827_v31, %v2645_v6  ;;  %v6828_v42 = vld [vmem:[#allocation104_spill] sm:$0xff]  ;;  %v6829_v14 = vld [vmem:[#allocation105_spill] sm:$0xff]  ;;  %v6830_v52 = vld [vmem:[#allocation106_spill] sm:$0xff]  ;;  %v2967_v50 = vadd.f32 %v2935_v16, %v6322_v17  ;;  %3010 = vst [vmem:[%s6449_s18 + $0x58] sm:$0xff] %v2978_v37 }
 0x2fd   : > { %v2964_v45 = vmul.f32 %v6828_v42, %v2645_v6  ;;  %v2965_v23 = vmul.f32 %v6829_v14, %v2645_v6  ;;  %v2966_v18 = vmul.f32 %v6830_v52, %v2645_v6  ;;  %v2968_v26 = vadd.f32 %v2936_v8, %v6325_v35  ;;  %v6835_v28 = vld [vmem:[#allocation47_spill] sm:$0xff]  ;;  %3017 = vst [vmem:[%s6449_s18 + $0x90] sm:$0xff] %v2985_v48 }
 0x2fe   : > { %v2971_v31 = vadd.f32 %v2939_v9, %v6334_v13  ;;  %v2972_v42 = vadd.f32 %v2940_v54, %v6337_v27  ;;  %v2973_v14 = vadd.f32 %v2941_v0, %v6340_v33  ;;  %v2974_v6 = vadd.f32 %v2942_v20, %v6343_v40  ;;  %2999 = vst [vmem:[%s6449_s18] sm:$0xff] %v2967_v50  ;;  %v6839_v8 = vld [vmem:[#allocation51_spill] sm:$0xff] }
 0x2ff   : > { %v2975_v17 = vadd.f32 %v2943_v21, %v6346_v41  ;;  %v2976_v35 = vadd.f32 %v2944_v1, %v6349_v46  ;;  %3000 = vst [vmem:[%s6449_s18 + $0x8] sm:$0xff] %v2968_v26  ;;  %v2979_v13 = vadd.f32 %v2947_v15, %v6358_v58  ;;  %v2980_v27 = vadd.f32 %v2948_v60, %v6361_v2 }
 0x300   : > { %v2981_v33 = vadd.f32 %v2949_v51, %v6364_v57  ;;  %v2982_v40 = vadd.f32 %v2950_v25, %v6367_v3  ;;  %3003 = vst [vmem:[%s6449_s18 + $0x20] sm:$0xff] %v2971_v31  ;;  %3004 = vst [vmem:[%s6449_s18 + $0x28] sm:$0xff] %v2972_v42  ;;  %v2983_v41 = vadd.f32 %v2951_v63, %v6370_v55  ;;  %v6831_v3 = vld [vmem:[#allocation43_spill] sm:$0xff] }
 0x301   : > { %3005 = vst [vmem:[%s6449_s18 + $0x30] sm:$0xff] %v2973_v14  ;;  %3006 = vst [vmem:[%s6449_s18 + $0x38] sm:$0xff] %v2974_v6  ;;  %v2984_v46 = vadd.f32 %v2952_v61, %v6373_v4  ;;  %v2986_v39 = vadd.f32 %v2954_v19, %v6379_v7  ;;  %v2987_v58 = vadd.f32 %v2955_v43, %v6382_v5  ;;  %v6832_v4 = vld [vmem:[#allocation44_spill] sm:$0xff]  ;;  %v6833_v7 = vld [vmem:[#allocation45_spill] sm:$0xff] }
 0x302   : > { %3007 = vst [vmem:[%s6449_s18 + $0x40] sm:$0xff] %v2975_v17  ;;  %3008 = vst [vmem:[%s6449_s18 + $0x48] sm:$0xff] %v2976_v35  ;;  %v2988_v2 = vadd.f32 %v2956_v38, %v6385_v53  ;;  %v2989_v57 = vadd.f32 %v2957_v62, %v6388_v56  ;;  %v2990_v55 = vadd.f32 %v2958_v29, %v6831_v3  ;;  %v6834_v5 = vld [vmem:[#allocation46_spill] sm:$0xff]  ;;  %v6836_v29 = vld [vmem:[#allocation48_spill] sm:$0xff] }
 0x303   : > { %3011 = vst [vmem:[%s6449_s18 + $0x60] sm:$0xff] %v2979_v13  ;;  %3012 = vst [vmem:[%s6449_s18 + $0x68] sm:$0xff] %v2980_v27  ;;  %v2991_v36 = vadd.f32 %v2959_v47, %v6832_v4  ;;  %v2992_v30 = vadd.f32 %v2960_v49, %v6833_v7  ;;  %v2993_v53 = vadd.f32 %v2961_v32, %v6834_v5  ;;  %v6837_v62 = vld [vmem:[#allocation49_spill] sm:$0xff]  ;;  %v6838_v49 = vld [vmem:[#allocation50_spill] sm:$0xff] }
 0x304   : > { %3013 = vst [vmem:[%s6449_s18 + $0x70] sm:$0xff] %v2981_v33  ;;  %3014 = vst [vmem:[%s6449_s18 + $0x78] sm:$0xff] %v2982_v40  ;;  %v2994_v56 = vadd.f32 %v2962_v11, %v6835_v28  ;;  %v2995_v47 = vadd.f32 %v2963_v59, %v6836_v29  ;;  %v2996_v38 = vadd.f32 %v2964_v45, %v6837_v62 }
 0x305   : > { %3015 = vst [vmem:[%s6449_s18 + $0x80] sm:$0xff] %v2983_v41  ;;  %3016 = vst [vmem:[%s6449_s18 + $0x88] sm:$0xff] %v2984_v46  ;;  %v2997_v16 = vadd.f32 %v2965_v23, %v6838_v49  ;;  %v2998_v12 = vadd.f32 %v2966_v18, %v6839_v8 }
 0x306   : > { %3018 = vst [vmem:[%s6449_s18 + $0x98] sm:$0xff] %v2986_v39  ;;  %3019 = vst [vmem:[%s6449_s18 + $0xa0] sm:$0xff] %v2987_v58 }
 0x307   : > { %3020 = vst [vmem:[%s6449_s18 + $0xa8] sm:$0xff] %v2988_v2  ;;  %3021 = vst [vmem:[%s6449_s18 + $0xb0] sm:$0xff] %v2989_v57 }
 0x308   : > { %3022 = vst [vmem:[%s6449_s18 + $0xb8] sm:$0xff] %v2990_v55  ;;  %3023 = vst [vmem:[%s6449_s18 + $0xc0] sm:$0xff] %v2991_v36 }
 0x309   : > { %3024 = vst [vmem:[%s6449_s18 + $0xc8] sm:$0xff] %v2992_v30  ;;  %3025 = vst [vmem:[%s6449_s18 + $0xd0] sm:$0xff] %v2993_v53 }
 0x30a   : > { %3026 = vst [vmem:[%s6449_s18 + $0xd8] sm:$0xff] %v2994_v56  ;;  %3027 = vst [vmem:[%s6449_s18 + $0xe0] sm:$0xff] %v2995_v47 }
 0x30b   : > { %3028 = vst [vmem:[%s6449_s18 + $0xe8] sm:$0xff] %v2996_v38  ;;  %3029 = vst [vmem:[%s6449_s18 + $0xf0] sm:$0xff] %v2997_v16 }
 0x30c   : > { %3030 = vst [vmem:[%s6449_s18 + $0xf8] sm:$0xff] %v2998_v12 }
 0x30d PF: > { %s16_s21 = sadd.s32 1, %s3932_s21  }
 0x30e   : > { %p13_p4 = scmp.ge.s32.totalorder %s16_s21, 4  }
 0x310   :  { %15 = sbr.rel (!%p13_p4) target bundleno = 1 (0x1), region = 74 }

</bundles_post_ra>
